<compile_context>
chip_gen: v5e
topology: v5e:2x2
jax: 0.10.0
libtpu: 0.0.40
codegen_flags: <defaults>
</compile_context>

<pallas_src>
import functools

import jax
import jax.numpy as jnp
from jax import lax
from jax.experimental import pallas as pl
from jax.experimental.pallas import tpu as pltpu

EPS = 1e-5


def _bn_relu(x, gamma, beta):
    """Training-mode BatchNorm (batch stats, biased variance) + ReLU.

    One pass over x for the statistics (sum and sum-of-squares together),
    stats folded into per-channel scale/bias so the elementwise apply is a
    single mul + add.  x: (P, C) f32; gamma/beta: (1, C) f32.
    """
    p = x.shape[0]
    inv_p = 1.0 / p
    s1 = jnp.sum(x, axis=0, keepdims=True)
    s2 = jnp.sum(x * x, axis=0, keepdims=True)
    mean = s1 * inv_p
    var = s2 * inv_p - mean * mean          # biased var (matches PyTorch fwd); f32 accumulation
    scale = gamma * lax.rsqrt(var + EPS)    # rsqrt -> EUP slot (free)
    bias = beta - mean * scale
    return jnp.maximum(x * scale + bias, 0.0)


def simkd_kernel(src_ref, tgt_ref,
                 w1_ref, g1_ref, b1_ref,
                 w2_ref, g2_ref, b2_ref,
                 w3_ref, g3_ref, b3_ref,
                 wc_ref, bc_ref,
                 pooled_s_ref, pooled_t_ref, pred_ref,
                 pad_ref,
                 *, N, H, W):
    P, Cs = src_ref.shape          # src already flattened to (N*H*W, Cs) bf16
    Cm = w1_ref.shape[1]
    Ct = w3_ref.shape[1]

    # ---- conv1x1 (Cs -> Cm) + BN + ReLU  (bf16 x bf16 -> f32) --------------
    h = jnp.dot(src_ref[...], w1_ref[...], preferred_element_type=jnp.float32)
    h = _bn_relu(h, g1_ref[...], b1_ref[...])                     # (P, Cm) f32

    # ---- conv3x3 (Cm -> Cm, padding=1) --------------------------------------
    # kx taps via sublane rolls + boundary masks (XLU/VPU, no unaligned slices),
    # concatenated along channels -> each ky step is a single K=3*Cm matmul.
    h4 = h.reshape(N, H, W, Cm)                                    # f32 (rolls stay f32)
    col = lax.broadcasted_iota(jnp.int32, (1, 1, W, 1), 2)
    left = jnp.where(col >= 1, pltpu.roll(h4, 1, 2), 0.0)          # in[.., x-1, .]
    right = jnp.where(col <= W - 2, pltpu.roll(h4, W - 1, 2), 0.0)  # in[.., x+1, .]
    taps = jnp.concatenate([left.astype(jnp.bfloat16),
                            h4.astype(jnp.bfloat16),
                            right.astype(jnp.bfloat16)], axis=-1)  # (N, H, W, 3*Cm) bf16

    # Pad only along H; zero only the two halo rows.  Scratch is bf16 so the
    # windows read back are directly MXU operands (no per-window cast).
    zero_row = jnp.zeros((N, 1, W, 3 * Cm), jnp.bfloat16)
    pad_ref[:, 0:1] = zero_row
    pad_ref[:, H + 1:H + 2] = zero_row
    pad_ref[:, 1:H + 1] = taps

    acc = jnp.dot(pad_ref[:, 0:H].reshape(P, 3 * Cm),
                  w2_ref[0], preferred_element_type=jnp.float32)
    for ky in (1, 2):
        win = pad_ref[:, ky:ky + H].reshape(P, 3 * Cm)
        acc = acc + jnp.dot(win, w2_ref[ky], preferred_element_type=jnp.float32)
    h = _bn_relu(acc, g2_ref[...], b2_ref[...])                    # (P, Cm) f32

    # ---- conv1x1 (Cm -> Ct) + BN + ReLU -------------------------------------
    h = jnp.dot(h.astype(jnp.bfloat16), w3_ref[...],
                preferred_element_type=jnp.float32)
    ts = _bn_relu(h, g3_ref[...], b3_ref[...])                     # (P, Ct) f32

    # ---- global average pools -----------------------------------------------
    pooled_s = jnp.mean(ts.reshape(N, H * W, Ct), axis=1)          # (N, Ct) f32
    pooled_t = jnp.mean(tgt_ref[...].astype(jnp.float32), axis=1)  # (N, Ct) f32

    pooled_s_ref[...] = pooled_s
    pooled_t_ref[...] = pooled_t

    # ---- reused teacher classifier (lane-dense padded output) ---------------
    pred_ref[...] = (jnp.dot(pooled_s.astype(jnp.bfloat16), wc_ref[...],
                             preferred_element_type=jnp.float32)
                     + bc_ref[...])


def adaptive_avg_pool2d(x, out_hw):
    """NCHW adaptive average pool; assumes input spatial divisible by output."""
    # TODO(synk): PyTorch's non-divisible adaptive-pooling windows are not handled.
    N, C, H, W = x.shape
    oh, ow = out_hw
    return x.reshape(N, C, oh, H // oh, ow, W // ow).mean(axis=(3, 5))


@jax.jit
def simkd_forward(feat_s, feat_t, params):
    s_H, t_H = feat_s.shape[2], feat_t.shape[2]
    if s_H > t_H:
        source = adaptive_avg_pool2d(feat_s, (t_H, t_H))
        target = feat_t
    else:
        source = feat_s
        target = adaptive_avg_pool2d(feat_t, (s_H, s_H))

    N, Cs, H, W = source.shape
    Ct = target.shape[1]
    Cm = params["w1"].shape[1]

    # NCHW -> NHWC, flatten spatial, cast to bf16 (fused by XLA outside the
    # kernel so no bf16 relayout/reshape happens inside VMEM).
    src = jnp.transpose(source, (0, 2, 3, 1)).reshape(N * H * W, Cs).astype(jnp.bfloat16)
    tgt = jnp.transpose(target, (0, 2, 3, 1)).reshape(N, H * W, Ct).astype(jnp.bfloat16)

    # Lane-dense classifier output: pad num_classes up to a multiple of 128.
    num_classes = params["wc"].shape[1]
    ncls_pad = ((num_classes + 127) // 128) * 128
    wc = jnp.pad(params["wc"], ((0, 0), (0, ncls_pad - num_classes))).astype(jnp.bfloat16)
    bc = jnp.pad(params["bc"], ((0, 0), (0, ncls_pad - num_classes)))

    vmem = pl.BlockSpec(memory_space=pltpu.MemorySpace.VMEM)
    kernel = functools.partial(simkd_kernel, N=N, H=H, W=W)

    pooled_s, pooled_t, pred_pad = pl.pallas_call(
        kernel,
        out_shape=(
            jax.ShapeDtypeStruct((N, Ct), jnp.float32),
            jax.ShapeDtypeStruct((N, Ct), jnp.float32),
            jax.ShapeDtypeStruct((N, ncls_pad), jnp.float32),
        ),
        in_specs=[vmem] * 13,
        out_specs=(vmem, vmem, vmem),
        scratch_shapes=[pltpu.VMEM((N, H + 2, W, 3 * Cm), jnp.bfloat16)],
        compiler_params=pltpu.CompilerParams(vmem_limit_bytes=64 * 1024 * 1024),
    )(
        src, tgt,
        params["w1"].astype(jnp.bfloat16), params["g1"], params["b1"],
        params["w2"].astype(jnp.bfloat16), params["g2"], params["b2"],
        params["w3"].astype(jnp.bfloat16), params["g3"], params["b3"],
        wc, bc,
    )
    return pooled_s, pooled_t, pred_pad[:, :num_classes]


def init_params(key, s_n, t_n, factor, num_classes):
    cm = t_n // factor
    ks = jax.random.split(key, 12)

    # Conv weights in PyTorch layout (out, in, kh, kw), re-packed for matmul.
    conv1 = jax.random.normal(ks[0], (cm, s_n, 1, 1), jnp.float32) * 0.1
    conv2 = jax.random.normal(ks[1], (cm, cm, 3, 3), jnp.float32) * 0.1
    conv3 = jax.random.normal(ks[2], (t_n, cm, 1, 1), jnp.float32) * 0.1
    cls_w = jax.random.normal(ks[3], (num_classes, t_n), jnp.float32) * 0.1
    cls_b = jax.random.normal(ks[4], (num_classes,), jnp.float32) * 0.1

    # w2 packed per ky as (3*cm, cm): rows ordered [kx=0 | kx=1 | kx=2] blocks,
    # matching the in-kernel tap concatenation [x-1 | x | x+1].
    w2 = jnp.stack([
        jnp.concatenate([conv2[:, :, ky, kx].T for kx in range(3)], axis=0)
        for ky in range(3)], axis=0)                                  # (3, 3cm, cm)

    params = {
        "w1": conv1[:, :, 0, 0].T,                                    # (s_n, cm)
        "g1": (1.0 + 0.1 * jax.random.normal(ks[5], (1, cm))).astype(jnp.float32),
        "b1": (0.1 * jax.random.normal(ks[6], (1, cm))).astype(jnp.float32),
        "w2": w2,
        "g2": (1.0 + 0.1 * jax.random.normal(ks[7], (1, cm))).astype(jnp.float32),
        "b2": (0.1 * jax.random.normal(ks[8], (1, cm))).astype(jnp.float32),
        "w3": conv3[:, :, 0, 0].T,                                    # (cm, t_n)
        "g3": (1.0 + 0.1 * jax.random.normal(ks[9], (1, t_n))).astype(jnp.float32),
        "b3": (0.1 * jax.random.normal(ks[10], (1, t_n))).astype(jnp.float32),
        "wc": cls_w.T,                                                # (t_n, n_cls)
        "bc": cls_b.reshape(1, num_classes),
    }
    return params


if __name__ == "__main__":
    s_n, t_n, factor, num_classes = 4, 8, 2, 10
    N, s_H, t_H = 2, 16, 8

    key = jax.random.PRNGKey(0)
    k_s, k_t, k_p = jax.random.split(key, 3)

    feat_s = jax.random.normal(k_s, (N, s_n, s_H, s_H), jnp.float32)
    feat_t = jax.random.normal(k_t, (N, t_n, t_H, t_H), jnp.float32)
    params = init_params(k_p, s_n, t_n, factor, num_classes)

    pooled_s, pooled_t, pred = simkd_forward(feat_s, feat_t, params)
    jax.block_until_ready((pooled_s, pooled_t, pred))

    assert pooled_s.shape == (N, t_n)
    assert pooled_t.shape == (N, t_n)
    assert pred.shape == (N, num_classes)
    print("KERNEL_OK")
</pallas_src>

<mosaic_0001>
module attributes {stable_mosaic.version = 11 : i64} {
  func.func @simkd_kernel(%arg0: memref<128x4xbf16, #tpu.memory_space<vmem>>, %arg1: memref<2x64x8xbf16, #tpu.memory_space<vmem>>, %arg2: memref<4x4xbf16, #tpu.memory_space<vmem>>, %arg3: memref<1x4xf32, #tpu.memory_space<vmem>>, %arg4: memref<1x4xf32, #tpu.memory_space<vmem>>, %arg5: memref<3x12x4xbf16, #tpu.memory_space<vmem>>, %arg6: memref<1x4xf32, #tpu.memory_space<vmem>>, %arg7: memref<1x4xf32, #tpu.memory_space<vmem>>, %arg8: memref<4x8xbf16, #tpu.memory_space<vmem>>, %arg9: memref<1x8xf32, #tpu.memory_space<vmem>>, %arg10: memref<1x8xf32, #tpu.memory_space<vmem>>, %arg11: memref<8x128xbf16, #tpu.memory_space<vmem>>, %arg12: memref<1x128xf32, #tpu.memory_space<vmem>>, %arg13: memref<2x8xf32, #tpu.memory_space<vmem>>, %arg14: memref<2x8xf32, #tpu.memory_space<vmem>>, %arg15: memref<2x128xf32, #tpu.memory_space<vmem>>, %arg16: memref<2x10x8x12xbf16, #tpu.memory_space<vmem>>) attributes {dimension_semantics = [], scalar_prefetch = 0 : i64, scratch_operands = 1 : i64, tpu.core_type = #tpu.core_type<tc>} {
    %c0 = arith.constant 0 : index
    %c0_0 = arith.constant 0 : index
    %0 = vector.load %arg0[%c0, %c0_0] : memref<128x4xbf16, #tpu.memory_space<vmem>>, vector<128x4xbf16>
    %c0_1 = arith.constant 0 : index
    %c0_2 = arith.constant 0 : index
    %1 = vector.load %arg2[%c0_1, %c0_2] : memref<4x4xbf16, #tpu.memory_space<vmem>>, vector<4x4xbf16>
    %cst = arith.constant dense<0.000000e+00> : vector<128x4xf32>
    %2 = tpu.matmul %0, %1, %cst {dimension_numbers = #tpu.dot_dimension_numbers<[1], [0], [0], [1], [0, 0, 1, 1], [], []>} : vector<128x4xbf16>, vector<4x4xbf16>, vector<128x4xf32> -> vector<128x4xf32>
    %c0_3 = arith.constant 0 : index
    %c0_4 = arith.constant 0 : index
    %3 = vector.load %arg3[%c0_3, %c0_4] : memref<1x4xf32, #tpu.memory_space<vmem>>, vector<1x4xf32>
    %c0_5 = arith.constant 0 : index
    %c0_6 = arith.constant 0 : index
    %4 = vector.load %arg4[%c0_5, %c0_6] : memref<1x4xf32, #tpu.memory_space<vmem>>, vector<1x4xf32>
    %cst_7 = arith.constant dense<0.000000e+00> : vector<4xf32>
    %5 = vector.multi_reduction <add>, %2, %cst_7 [0] : vector<128x4xf32> to vector<4xf32>
    %6 = vector.shape_cast %5 : vector<4xf32> to vector<1x4xf32>
    %7 = arith.mulf %2, %2 : vector<128x4xf32>
    %cst_8 = arith.constant dense<0.000000e+00> : vector<4xf32>
    %8 = vector.multi_reduction <add>, %7, %cst_8 [0] : vector<128x4xf32> to vector<4xf32>
    %9 = vector.shape_cast %8 : vector<4xf32> to vector<1x4xf32>
    %cst_9 = arith.constant 7.812500e-03 : f32
    %10 = vector.broadcast %cst_9 : f32 to vector<1x4xf32>
    %11 = arith.mulf %6, %10 : vector<1x4xf32>
    %cst_10 = arith.constant 7.812500e-03 : f32
    %12 = vector.broadcast %cst_10 : f32 to vector<1x4xf32>
    %13 = arith.mulf %9, %12 : vector<1x4xf32>
    %14 = arith.mulf %11, %11 : vector<1x4xf32>
    %15 = arith.subf %13, %14 : vector<1x4xf32>
    %cst_11 = arith.constant 9.99999974E-6 : f32
    %16 = vector.broadcast %cst_11 : f32 to vector<1x4xf32>
    %17 = arith.addf %15, %16 : vector<1x4xf32>
    %18 = math.rsqrt %17 : vector<1x4xf32>
    %19 = arith.mulf %3, %18 : vector<1x4xf32>
    %20 = arith.mulf %11, %19 : vector<1x4xf32>
    %21 = arith.subf %4, %20 : vector<1x4xf32>
    %22 = vector.broadcast %19 : vector<1x4xf32> to vector<128x4xf32>
    %23 = arith.mulf %2, %22 : vector<128x4xf32>
    %24 = vector.broadcast %21 : vector<1x4xf32> to vector<128x4xf32>
    %25 = arith.addf %23, %24 : vector<128x4xf32>
    %cst_12 = arith.constant 0.000000e+00 : f32
    %26 = vector.broadcast %cst_12 : f32 to vector<128x4xf32>
    %27 = arith.maximumf %25, %26 : vector<128x4xf32>
    %28 = vector.shape_cast %27 : vector<128x4xf32> to vector<2x8x8x4xf32>
    %29 = tpu.iota {dimensions = array<i32: 2>} : vector<1x1x8x1xi32>
    %c1_i32 = arith.constant 1 : i32
    %30 = vector.broadcast %c1_i32 : i32 to vector<1x1x8x1xi32>
    %31 = arith.cmpi sge, %29, %30 : vector<1x1x8x1xi32>
    %c1_i32_13 = arith.constant 1 : i32
    %32 = tpu.dynamic_rotate %28 by %c1_i32_13 dim 2 : vector<2x8x8x4xf32>, i32 -> vector<2x8x8x4xf32>
    %cst_14 = arith.constant 0.000000e+00 : f32
    %33 = vector.shape_cast %31 : vector<1x1x8x1xi1> to vector<1x1x8x1xi1>
    %34 = vector.broadcast %33 : vector<1x1x8x1xi1> to vector<2x8x8x4xi1>
    %35 = vector.broadcast %cst_14 : f32 to vector<2x8x8x4xf32>
    %36 = arith.select %34, %32, %35 : vector<2x8x8x4xi1>, vector<2x8x8x4xf32>
    %c6_i32 = arith.constant 6 : i32
    %37 = vector.broadcast %c6_i32 : i32 to vector<1x1x8x1xi32>
    %38 = arith.cmpi sle, %29, %37 : vector<1x1x8x1xi32>
    %c7_i32 = arith.constant 7 : i32
    %39 = tpu.dynamic_rotate %28 by %c7_i32 dim 2 : vector<2x8x8x4xf32>, i32 -> vector<2x8x8x4xf32>
    %cst_15 = arith.constant 0.000000e+00 : f32
    %40 = vector.shape_cast %38 : vector<1x1x8x1xi1> to vector<1x1x8x1xi1>
    %41 = vector.broadcast %40 : vector<1x1x8x1xi1> to vector<2x8x8x4xi1>
    %42 = vector.broadcast %cst_15 : f32 to vector<2x8x8x4xf32>
    %43 = arith.select %41, %39, %42 : vector<2x8x8x4xi1>, vector<2x8x8x4xf32>
    %44 = arith.truncf %36 : vector<2x8x8x4xf32> to vector<2x8x8x4xbf16>
    %45 = arith.truncf %28 : vector<2x8x8x4xf32> to vector<2x8x8x4xbf16>
    %46 = arith.truncf %43 : vector<2x8x8x4xf32> to vector<2x8x8x4xbf16>
    %47 = tpu.concatenate %44, %45, %46 in 3 : vector<2x8x8x4xbf16>, vector<2x8x8x4xbf16>, vector<2x8x8x4xbf16> -> vector<2x8x8x12xbf16>
    %cst_16 = arith.constant 0.000000e+00 : bf16
    %48 = vector.broadcast %cst_16 : bf16 to vector<2x1x8x12xbf16>
    %c0_17 = arith.constant 0 : index
    %c0_18 = arith.constant 0 : index
    %c0_19 = arith.constant 0 : index
    %c0_20 = arith.constant 0 : index
    %49 = vector.load %arg16[%c0_17, %c0_18, %c0_19, %c0_20] : memref<2x10x8x12xbf16, #tpu.memory_space<vmem>>, vector<2x1x8x12xbf16>
    tpu.vector_store %arg16[%c0_17, %c0_18, %c0_19, %c0_20], %48 {strides = array<i32>} : memref<2x10x8x12xbf16, #tpu.memory_space<vmem>>, vector<2x1x8x12xbf16>,
    %c0_21 = arith.constant 0 : index
    %c9 = arith.constant 9 : index
    %c0_22 = arith.constant 0 : index
    %c0_23 = arith.constant 0 : index
    %50 = vector.load %arg16[%c0_21, %c9, %c0_22, %c0_23] : memref<2x10x8x12xbf16, #tpu.memory_space<vmem>>, vector<2x1x8x12xbf16>
    tpu.vector_store %arg16[%c0_21, %c9, %c0_22, %c0_23], %48 {strides = array<i32>} : memref<2x10x8x12xbf16, #tpu.memory_space<vmem>>, vector<2x1x8x12xbf16>,
    %c0_24 = arith.constant 0 : index
    %c1 = arith.constant 1 : index
    %c0_25 = arith.constant 0 : index
    %c0_26 = arith.constant 0 : index
    %51 = vector.load %arg16[%c0_24, %c1, %c0_25, %c0_26] : memref<2x10x8x12xbf16, #tpu.memory_space<vmem>>, vector<2x8x8x12xbf16>
    tpu.vector_store %arg16[%c0_24, %c1, %c0_25, %c0_26], %47 {strides = array<i32>} : memref<2x10x8x12xbf16, #tpu.memory_space<vmem>>, vector<2x8x8x12xbf16>,
    %c0_27 = arith.constant 0 : index
    %c0_28 = arith.constant 0 : index
    %c0_29 = arith.constant 0 : index
    %c0_30 = arith.constant 0 : index
    %52 = vector.load %arg16[%c0_27, %c0_28, %c0_29, %c0_30] : memref<2x10x8x12xbf16, #tpu.memory_space<vmem>>, vector<2x8x8x12xbf16>
    %53 = vector.shape_cast %52 : vector<2x8x8x12xbf16> to vector<128x12xbf16>
    %c0_31 = arith.constant 0 : index
    %c0_32 = arith.constant 0 : index
    %c0_33 = arith.constant 0 : index
    %54 = vector.load %arg5[%c0_31, %c0_32, %c0_33] : memref<3x12x4xbf16, #tpu.memory_space<vmem>>, vector<1x12x4xbf16>
    %55 = vector.shape_cast %54 : vector<1x12x4xbf16> to vector<12x4xbf16>
    %cst_34 = arith.constant dense<0.000000e+00> : vector<128x4xf32>
    %56 = tpu.matmul %53, %55, %cst_34 {dimension_numbers = #tpu.dot_dimension_numbers<[1], [0], [0], [1], [0, 0, 1, 1], [], []>} : vector<128x12xbf16>, vector<12x4xbf16>, vector<128x4xf32> -> vector<128x4xf32>
    %c0_35 = arith.constant 0 : index
    %c1_36 = arith.constant 1 : index
    %c0_37 = arith.constant 0 : index
    %c0_38 = arith.constant 0 : index
    %57 = vector.load %arg16[%c0_35, %c1_36, %c0_37, %c0_38] : memref<2x10x8x12xbf16, #tpu.memory_space<vmem>>, vector<2x8x8x12xbf16>
    %58 = vector.shape_cast %57 : vector<2x8x8x12xbf16> to vector<128x12xbf16>
    %c1_39 = arith.constant 1 : index
    %c0_40 = arith.constant 0 : index
    %c0_41 = arith.constant 0 : index
    %59 = vector.load %arg5[%c1_39, %c0_40, %c0_41] : memref<3x12x4xbf16, #tpu.memory_space<vmem>>, vector<1x12x4xbf16>
    %60 = vector.shape_cast %59 : vector<1x12x4xbf16> to vector<12x4xbf16>
    %cst_42 = arith.constant dense<0.000000e+00> : vector<128x4xf32>
    %61 = tpu.matmul %58, %60, %cst_42 {dimension_numbers = #tpu.dot_dimension_numbers<[1], [0], [0], [1], [0, 0, 1, 1], [], []>} : vector<128x12xbf16>, vector<12x4xbf16>, vector<128x4xf32> -> vector<128x4xf32>
    %62 = arith.addf %56, %61 : vector<128x4xf32>
    %c0_43 = arith.constant 0 : index
    %c2 = arith.constant 2 : index
    %c0_44 = arith.constant 0 : index
    %c0_45 = arith.constant 0 : index
    %63 = vector.load %arg16[%c0_43, %c2, %c0_44, %c0_45] : memref<2x10x8x12xbf16, #tpu.memory_space<vmem>>, vector<2x8x8x12xbf16>
    %64 = vector.shape_cast %63 : vector<2x8x8x12xbf16> to vector<128x12xbf16>
    %c2_46 = arith.constant 2 : index
    %c0_47 = arith.constant 0 : index
    %c0_48 = arith.constant 0 : index
    %65 = vector.load %arg5[%c2_46, %c0_47, %c0_48] : memref<3x12x4xbf16, #tpu.memory_space<vmem>>, vector<1x12x4xbf16>
    %66 = vector.shape_cast %65 : vector<1x12x4xbf16> to vector<12x4xbf16>
    %cst_49 = arith.constant dense<0.000000e+00> : vector<128x4xf32>
    %67 = tpu.matmul %64, %66, %cst_49 {dimension_numbers = #tpu.dot_dimension_numbers<[1], [0], [0], [1], [0, 0, 1, 1], [], []>} : vector<128x12xbf16>, vector<12x4xbf16>, vector<128x4xf32> -> vector<128x4xf32>
    %68 = arith.addf %62, %67 : vector<128x4xf32>
    %c0_50 = arith.constant 0 : index
    %c0_51 = arith.constant 0 : index
    %69 = vector.load %arg6[%c0_50, %c0_51] : memref<1x4xf32, #tpu.memory_space<vmem>>, vector<1x4xf32>
    %c0_52 = arith.constant 0 : index
    %c0_53 = arith.constant 0 : index
    %70 = vector.load %arg7[%c0_52, %c0_53] : memref<1x4xf32, #tpu.memory_space<vmem>>, vector<1x4xf32>
    %cst_54 = arith.constant dense<0.000000e+00> : vector<4xf32>
    %71 = vector.multi_reduction <add>, %68, %cst_54 [0] : vector<128x4xf32> to vector<4xf32>
    %72 = vector.shape_cast %71 : vector<4xf32> to vector<1x4xf32>
    %73 = arith.mulf %68, %68 : vector<128x4xf32>
    %cst_55 = arith.constant dense<0.000000e+00> : vector<4xf32>
    %74 = vector.multi_reduction <add>, %73, %cst_55 [0] : vector<128x4xf32> to vector<4xf32>
    %75 = vector.shape_cast %74 : vector<4xf32> to vector<1x4xf32>
    %cst_56 = arith.constant 7.812500e-03 : f32
    %76 = vector.broadcast %cst_56 : f32 to vector<1x4xf32>
    %77 = arith.mulf %72, %76 : vector<1x4xf32>
    %cst_57 = arith.constant 7.812500e-03 : f32
    %78 = vector.broadcast %cst_57 : f32 to vector<1x4xf32>
    %79 = arith.mulf %75, %78 : vector<1x4xf32>
    %80 = arith.mulf %77, %77 : vector<1x4xf32>
    %81 = arith.subf %79, %80 : vector<1x4xf32>
    %cst_58 = arith.constant 9.99999974E-6 : f32
    %82 = vector.broadcast %cst_58 : f32 to vector<1x4xf32>
    %83 = arith.addf %81, %82 : vector<1x4xf32>
    %84 = math.rsqrt %83 : vector<1x4xf32>
    %85 = arith.mulf %69, %84 : vector<1x4xf32>
    %86 = arith.mulf %77, %85 : vector<1x4xf32>
    %87 = arith.subf %70, %86 : vector<1x4xf32>
    %88 = vector.broadcast %85 : vector<1x4xf32> to vector<128x4xf32>
    %89 = arith.mulf %68, %88 : vector<128x4xf32>
    %90 = vector.broadcast %87 : vector<1x4xf32> to vector<128x4xf32>
    %91 = arith.addf %89, %90 : vector<128x4xf32>
    %cst_59 = arith.constant 0.000000e+00 : f32
    %92 = vector.broadcast %cst_59 : f32 to vector<128x4xf32>
    %93 = arith.maximumf %91, %92 : vector<128x4xf32>
    %94 = arith.truncf %93 : vector<128x4xf32> to vector<128x4xbf16>
    %c0_60 = arith.constant 0 : index
    %c0_61 = arith.constant 0 : index
    %95 = vector.load %arg8[%c0_60, %c0_61] : memref<4x8xbf16, #tpu.memory_space<vmem>>, vector<4x8xbf16>
    %cst_62 = arith.constant dense<0.000000e+00> : vector<128x8xf32>
    %96 = tpu.matmul %94, %95, %cst_62 {dimension_numbers = #tpu.dot_dimension_numbers<[1], [0], [0], [1], [0, 0, 1, 1], [], []>} : vector<128x4xbf16>, vector<4x8xbf16>, vector<128x8xf32> -> vector<128x8xf32>
    %c0_63 = arith.constant 0 : index
    %c0_64 = arith.constant 0 : index
    %97 = vector.load %arg9[%c0_63, %c0_64] : memref<1x8xf32, #tpu.memory_space<vmem>>, vector<1x8xf32>
    %c0_65 = arith.constant 0 : index
    %c0_66 = arith.constant 0 : index
    %98 = vector.load %arg10[%c0_65, %c0_66] : memref<1x8xf32, #tpu.memory_space<vmem>>, vector<1x8xf32>
    %cst_67 = arith.constant dense<0.000000e+00> : vector<8xf32>
    %99 = vector.multi_reduction <add>, %96, %cst_67 [0] : vector<128x8xf32> to vector<8xf32>
    %100 = vector.shape_cast %99 : vector<8xf32> to vector<1x8xf32>
    %101 = arith.mulf %96, %96 : vector<128x8xf32>
    %cst_68 = arith.constant dense<0.000000e+00> : vector<8xf32>
    %102 = vector.multi_reduction <add>, %101, %cst_68 [0] : vector<128x8xf32> to vector<8xf32>
    %103 = vector.shape_cast %102 : vector<8xf32> to vector<1x8xf32>
    %cst_69 = arith.constant 7.812500e-03 : f32
    %104 = vector.broadcast %cst_69 : f32 to vector<1x8xf32>
    %105 = arith.mulf %100, %104 : vector<1x8xf32>
    %cst_70 = arith.constant 7.812500e-03 : f32
    %106 = vector.broadcast %cst_70 : f32 to vector<1x8xf32>
    %107 = arith.mulf %103, %106 : vector<1x8xf32>
    %108 = arith.mulf %105, %105 : vector<1x8xf32>
    %109 = arith.subf %107, %108 : vector<1x8xf32>
    %cst_71 = arith.constant 9.99999974E-6 : f32
    %110 = vector.broadcast %cst_71 : f32 to vector<1x8xf32>
    %111 = arith.addf %109, %110 : vector<1x8xf32>
    %112 = math.rsqrt %111 : vector<1x8xf32>
    %113 = arith.mulf %97, %112 : vector<1x8xf32>
    %114 = arith.mulf %105, %113 : vector<1x8xf32>
    %115 = arith.subf %98, %114 : vector<1x8xf32>
    %116 = vector.broadcast %113 : vector<1x8xf32> to vector<128x8xf32>
    %117 = arith.mulf %96, %116 : vector<128x8xf32>
    %118 = vector.broadcast %115 : vector<1x8xf32> to vector<128x8xf32>
    %119 = arith.addf %117, %118 : vector<128x8xf32>
    %cst_72 = arith.constant 0.000000e+00 : f32
    %120 = vector.broadcast %cst_72 : f32 to vector<128x8xf32>
    %121 = arith.maximumf %119, %120 : vector<128x8xf32>
    %122 = vector.shape_cast %121 : vector<128x8xf32> to vector<2x64x8xf32>
    %cst_73 = arith.constant dense<0.000000e+00> : vector<2x8xf32>
    %123 = vector.multi_reduction <add>, %122, %cst_73 [1] : vector<2x64x8xf32> to vector<2x8xf32>
    %cst_74 = arith.constant 6.400000e+01 : f32
    %124 = vector.broadcast %cst_74 : f32 to vector<2x8xf32>
    %125 = arith.divf %123, %124 : vector<2x8xf32>
    %c0_75 = arith.constant 0 : index
    %c0_76 = arith.constant 0 : index
    %c0_77 = arith.constant 0 : index
    %126 = vector.load %arg1[%c0_75, %c0_76, %c0_77] : memref<2x64x8xbf16, #tpu.memory_space<vmem>>, vector<2x64x8xbf16>
    %127 = arith.extf %126 : vector<2x64x8xbf16> to vector<2x64x8xf32>
    %cst_78 = arith.constant dense<0.000000e+00> : vector<2x8xf32>
    %128 = vector.multi_reduction <add>, %127, %cst_78 [1] : vector<2x64x8xf32> to vector<2x8xf32>
    %cst_79 = arith.constant 6.400000e+01 : f32
    %129 = vector.broadcast %cst_79 : f32 to vector<2x8xf32>
    %130 = arith.divf %128, %129 : vector<2x8xf32>
    %c0_80 = arith.constant 0 : index
    %c0_81 = arith.constant 0 : index
    %131 = vector.load %arg13[%c0_80, %c0_81] : memref<2x8xf32, #tpu.memory_space<vmem>>, vector<2x8xf32>
    tpu.vector_store %arg13[%c0_80, %c0_81], %125 {strides = array<i32>} : memref<2x8xf32, #tpu.memory_space<vmem>>, vector<2x8xf32>,
    %c0_82 = arith.constant 0 : index
    %c0_83 = arith.constant 0 : index
    %132 = vector.load %arg14[%c0_82, %c0_83] : memref<2x8xf32, #tpu.memory_space<vmem>>, vector<2x8xf32>
    tpu.vector_store %arg14[%c0_82, %c0_83], %130 {strides = array<i32>} : memref<2x8xf32, #tpu.memory_space<vmem>>, vector<2x8xf32>,
    %133 = arith.truncf %125 : vector<2x8xf32> to vector<2x8xbf16>
    %c0_84 = arith.constant 0 : index
    %c0_85 = arith.constant 0 : index
    %134 = vector.load %arg11[%c0_84, %c0_85] : memref<8x128xbf16, #tpu.memory_space<vmem>>, vector<8x128xbf16>
    %cst_86 = arith.constant dense<0.000000e+00> : vector<2x128xf32>
    %135 = tpu.matmul %133, %134, %cst_86 {dimension_numbers = #tpu.dot_dimension_numbers<[1], [0], [0], [1], [0, 0, 1, 1], [], []>} : vector<2x8xbf16>, vector<8x128xbf16>, vector<2x128xf32> -> vector<2x128xf32>
    %c0_87 = arith.constant 0 : index
    %c0_88 = arith.constant 0 : index
    %136 = vector.load %arg12[%c0_87, %c0_88] : memref<1x128xf32, #tpu.memory_space<vmem>>, vector<1x128xf32>
    %137 = vector.broadcast %136 : vector<1x128xf32> to vector<2x128xf32>
    %138 = arith.addf %135, %137 : vector<2x128xf32>
    %c0_89 = arith.constant 0 : index
    %c0_90 = arith.constant 0 : index
    %139 = vector.load %arg15[%c0_89, %c0_90] : memref<2x128xf32, #tpu.memory_space<vmem>>, vector<2x128xf32>
    tpu.vector_store %arg15[%c0_89, %c0_90], %138 {strides = array<i32>} : memref<2x128xf32, #tpu.memory_space<vmem>>, vector<2x128xf32>,
    return
  }
}

</mosaic_0001>

<bundles_post_ra>
// kernel: simkd_forward.1
= control target key start
LH: loop header
LB: loop body
LE: loop exit
PB: predicated region body
PF: predicated region fallthrough
CT: control target
= control target key end

     0   :  { %21 = vsyncpa [#allocation4], 0  ;;  %vm132_vm0 = vcmask 1041408   ;;  %vm107_vm1 = vcmask 31744   ;;  %s3129_s0 = inlined_call_operand.vmem [shape: bf16[128,4], index: 0, kind: input, shape index: {}]   ;;  %s3130_s1 = inlined_call_operand.vmem [shape: bf16[2,64,8], index: 1, kind: input, shape index: {}]   ;;  %s3131_s2 = inlined_call_operand.vmem [shape: bf16[4,4], index: 2, kind: input, shape index: {}]   ;;  %s3132_s3 = inlined_call_operand.vmem [shape: f32[1,4], index: 3, kind: input, shape index: {}]   ;;  %s3133_s4 = inlined_call_operand.vmem [shape: f32[1,4], index: 4, kind: input, shape index: {}]   ;;  %s3134_s5 = inlined_call_operand.vmem [shape: bf16[3,12,4], index: 5, kind: input, shape index: {}]   ;;  %s3135_s6 = inlined_call_operand.vmem [shape: f32[1,4], index: 6, kind: input, shape index: {}]   ;;  %s3136_s7 = inlined_call_operand.vmem [shape: f32[1,4], index: 7, kind: input, shape index: {}]   ;;  %s3137_s8 = inlined_call_operand.vmem [shape: bf16[4,8], index: 8, kind: input, shape index: {}]   ;;  %s3138_s9 = inlined_call_operand.vmem [shape: f32[1,8], index: 9, kind: input, shape index: {}]   ;;  %s3139_s10 = inlined_call_operand.vmem [shape: f32[1,8], index: 10, kind: input, shape index: {}]   ;;  %s3140_s11 = inlined_call_operand.vmem [shape: bf16[8,128], index: 11, kind: input, shape index: {}]   ;;  %s3141_s12 = inlined_call_operand.vmem [shape: f32[1,128], index: 12, kind: input, shape index: {}]   ;;  %s3142_s13 = inlined_call_operand.hbm [shape: f32[2,8], index: 13, kind: output, shape index: {0}]   ;;  %s3143_s14 = inlined_call_operand.hbm [shape: f32[2,8], index: 14, kind: output, shape index: {1}]   ;;  %s3144_s15 = inlined_call_operand.hbm [shape: f32[2,128], index: 15, kind: output, shape index: {2}]  }
   0x1   :  { %v66_v0 = vld [vmem:[%s3131_s2] sm:$0x3]  ;;  %v2008_v3 = vld [vmem:[%s3129_s0 + $0x18] sm:$0xff]  ;;  %v2011_v4 = vld [vmem:[%s3129_s0 + $0x30] sm:$0xff] }
   0x2   :  { %v134_v1 = vsel %vm132_vm0, %v66_v0, 0  ;;  %v2005_v2 = vld [vmem:[%s3129_s0] sm:$0xff] }
   0x3   :  { %143 = vmatpush.bf16.msra.mxu0 %v134_v1  ;;  %2079 = vmatpush.bf16.msra.mxu2 %v134_v1 }
   0x4   :  { %22 = vsyncpa [#allocation6], 0  ;;  %2080 = vmatpush.bf16.msra.mxu3 %v134_v1  ;;  %v2006_v5 = vld [vmem:[%s3129_s0 + $0x8] sm:$0xff]  ;;  %v2009_v6 = vld [vmem:[%s3129_s0 + $0x20] sm:$0xff]  ;;  %vm856_vm7 = vcmask 1045504   ;;  %vm726_vm8 = vcmask 93184  }
   0x5   :  { %v2012_v7 = vld [vmem:[%s3129_s0 + $0x38] sm:$0xff]  ;;  %v2007_v8 = vld [vmem:[%s3129_s0 + $0x10] sm:$0xff]  ;;  %v2010_v9 = vld [vmem:[%s3129_s0 + $0x28] sm:$0xff]  ;;  %vm677_vm9 = vcmask 64512   ;;  %vm831_vm10 = vcmask 97280   ;;  %vm1755_vm14 = vcmask 1043456  }
   0x6   :  { %1852 = vmatmul.msk.bf16.vlgmr.msra.gmra.mxu0 %vm107_vm1, %v2005_v2  ;;  %1855 = vmatmul.msk.bf16.vlgmr.msra.gmra.mxu2 %vm107_vm1, %v2008_v3  ;;  %s1780_s25 = sshll.u32 %s3142_s13, 4  ;;  %s1802_s24 = sshll.u32 %s3144_s15, 4  ;;  %s1781_s25 = int_to_ptr.hbm [resolvable:$true] %s1780_s25  ;;  %s1803_s24 = int_to_ptr.hbm [resolvable:$true] %s1802_s24 }
   0x7   :  { %1858 = vmatmul.msk.bf16.vlgmr.msra.gmra.mxu3 %vm107_vm1, %v2011_v4 }
  0x16   :  { %1853 = vmatmul.msk.bf16.gmra.mxu0 %vm107_vm1, %v2006_v5  ;;  %1856 = vmatmul.msk.bf16.gmra.mxu2 %vm107_vm1, %v2009_v6 }
  0x17   :  { %1859 = vmatmul.msk.bf16.gmra.mxu3 %vm107_vm1, %v2012_v7 }
  0x26   :  { %1854 = vmatmul.msk.bf16.gmra.mxu0 %vm107_vm1, %v2007_v8  ;;  %1857 = vmatmul.msk.bf16.gmra.mxu2 %vm107_vm1, %v2010_v9 }
  0x83   :  { %v2296_v10 = vpop.f32.mrf.mxu0 }
  0x84   :  { %v224_v20 = vmul.f32 %v2296_v10, %v2296_v10  ;;  %v187_v24 = vsel %vm107_vm1, %v2296_v10, 0.0 }
  0x86   :  { %v240_v29 = vsel %vm107_vm1, %v224_v20, 0.0 }
  0x89   :  { %v2298_v11 = vpop.f32.mrf.mxu2 }
  0x8a   :  { %v2310_v17 = vpop.f32.mrf.mxu3  ;;  %v230_v45 = vmul.f32 %v2298_v11, %v2298_v11  ;;  %v198_v50 = vsel %vm107_vm1, %v2298_v11, 0.0 }
  0x8b   :  { %v2300_v12 = vpop.f32.mrf.mxu0 }
  0x8c   :  { %v225_v18 = vmul.f32 %v2300_v12, %v2300_v12  ;;  %v188_v21 = vsel %vm107_vm1, %v2300_v12, 0.0  ;;  %v251_v55 = vsel %vm107_vm1, %v230_v45, 0.0 }
  0x8d   :  { %v189_v28 = vadd.f32 %v188_v21, %v187_v24 }
  0x8e   :  { %v241_v25 = vsel %vm107_vm1, %v225_v18, 0.0 }
  0x8f   :  { %v242_v33 = vadd.f32 %v241_v25, %v240_v29 }
  0x91   :  { %v2302_v13 = vpop.f32.mrf.mxu2 }
  0x92   :  { %v2337_v35 = vpop.f32.mrf.mxu3  ;;  %v231_v51 = vmul.f32 %v2302_v13, %v2302_v13  ;;  %v200_v56 = vsel %vm107_vm1, %v2302_v13, 0.0 }
  0x93   :  { %v2304_v14 = vpop.f32.mrf.mxu0  ;;  %v237_v29 = vmul.f32 %v2337_v35, %v2337_v35 }
  0x94   :  { %v226_v22 = vmul.f32 %v2304_v14, %v2304_v14  ;;  %v190_v26 = vsel %vm107_vm1, %v2304_v14, 0.0  ;;  %v253_v61 = vsel %vm107_vm1, %v231_v51, 0.0 }
  0x95   :  { %v191_v34 = vadd.f32 %v190_v26, %v189_v28  ;;  %v210_v28 = vsel %vm107_vm1, %v2310_v17, 0.0 }
  0x96   :  { %v243_v30 = vsel %vm107_vm1, %v226_v22, 0.0  ;;  %v236_v22 = vmul.f32 %v2310_v17, %v2310_v17 }
  0x97   :  { %v244_v38 = vadd.f32 %v243_v30, %v242_v33 }
  0x99   :  { %v2306_v15 = vpop.f32.mrf.mxu2 }
  0x9a   :  { %v232_v57 = vmul.f32 %v2306_v15, %v2306_v15  ;;  %v2363_v60 = vpop.f32.mrf.mxu3  ;;  %v202_v62 = vsel %vm107_vm1, %v2306_v15, 0.0 }
  0x9b   :  { %v2308_v16 = vpop.f32.mrf.mxu0 }
  0x9c   :  { %v227_v27 = vmul.f32 %v2308_v16, %v2308_v16  ;;  %v192_v31 = vsel %vm107_vm1, %v2308_v16, 0.0  ;;  %v255_v3 = vsel %vm107_vm1, %v232_v57, 0.0 }
  0x9d   :  { %v193_v39 = vadd.f32 %v192_v31, %v191_v34  ;;  %v263_v34 = vsel %vm107_vm1, %v236_v22, 0.0  ;;  %v185_v22 = vld [vmem:[%s3132_s3] sm:$0x1]  ;;  %s2173_s3 = smov 4  }
  0x9e   :  { %v245_v36 = vsel %vm107_vm1, %v227_v27, 0.0 }
  0x9f   :  { %v246_v42 = vadd.f32 %v245_v36, %v244_v38  ;;  %v212_v36 = vsel %vm107_vm1, %v2337_v35, 0.0 }
  0xa1   :  { %v2314_v19 = vpop.f32.mrf.mxu2 }
  0xa2   :  { %v233_v63 = vmul.f32 %v2314_v19, %v2314_v19  ;;  %v204_v4 = vsel %vm107_vm1, %v2314_v19, 0.0  ;;  %v182_v33 = vpop.f32.mrf.mxu3 }
  0xa3   :  { %v2322_v23 = vpop.f32.mrf.mxu0 }
  0xa4   :  { %v228_v32 = vmul.f32 %v2322_v23, %v2322_v23  ;;  %v194_v37 = vsel %vm107_vm1, %v2322_v23, 0.0  ;;  %v257_v8 = vsel %vm107_vm1, %v233_v63, 0.0 }
  0xa5   :  { %v195_v43 = vadd.f32 %v194_v37, %v193_v39  ;;  %v238_v37 = vmul.f32 %v2363_v60, %v2363_v60 }
  0xa6   :  { %v247_v41 = vsel %vm107_vm1, %v228_v32, 0.0 }
  0xa7   :  { %v248_v48 = vadd.f32 %v247_v41, %v246_v42  ;;  %v265_v41 = vsel %vm107_vm1, %v237_v29, 0.0  ;;  %v214_v42 = vsel %vm107_vm1, %v2363_v60, 0.0 }
  0xa9   :  { %v2342_v40 = vpop.f32.mrf.mxu2 }
  0xaa   :  { %v234_v5 = vmul.f32 %v2342_v40, %v2342_v40  ;;  %v206_v9 = vsel %vm107_vm1, %v2342_v40, 0.0 }
  0xab   :  { %v2345_v44 = vpop.f32.mrf.mxu0 }
  0xac   :  { %v196_v46 = vsel %vm107_vm1, %v2345_v44, 0.0  ;;  %v229_v47 = vmul.f32 %v2345_v44, %v2345_v44  ;;  %v259_v24 = vsel %vm107_vm1, %v234_v5, 0.0 }
  0xad   :  { %v197_v49 = vadd.f32 %v196_v46, %v195_v43  ;;  %v239_v43 = vmul.f32 %v182_v33, %v182_v33 }
  0xae   :  { %v249_v52 = vsel %vm107_vm1, %v229_v47, 0.0  ;;  %v267_v47 = vsel %vm107_vm1, %v238_v37, 0.0 }
  0xaf   :  { %v199_v53 = vadd.f32 %v198_v50, %v197_v49  ;;  %v250_v54 = vadd.f32 %v249_v52, %v248_v48  ;;  %v216_v48 = vsel %vm107_vm1, %v182_v33, 0.0  ;;  %v269_v51 = vsel %vm107_vm1, %v239_v43, 0.0 }
  0xb1   :  { %v201_v58 = vadd.f32 %v200_v56, %v199_v53  ;;  %v252_v59 = vadd.f32 %v251_v55, %v250_v54  ;;  %v2370_v1 = vpop.f32.mrf.mxu2 }
  0xb2   :  { %v235_v18 = vmul.f32 %v2370_v1, %v2370_v1  ;;  %v208_v25 = vsel %vm107_vm1, %v2370_v1, 0.0 }
  0xb3   :  { %v254_v0 = vadd.f32 %v253_v61, %v252_v59  ;;  %v203_v2 = vadd.f32 %v202_v62, %v201_v58 }
  0xb4   :  { %v261_v30 = vsel %vm107_vm1, %v235_v18, 0.0 }
  0xb5   :  { %v205_v6 = vadd.f32 %v204_v4, %v203_v2  ;;  %v256_v7 = vadd.f32 %v255_v3, %v254_v0 }
  0xb7   :  { %v207_v20 = vadd.f32 %v206_v9, %v205_v6  ;;  %v258_v21 = vadd.f32 %v257_v8, %v256_v7 }
  0xb9   :  { %v209_v26 = vadd.f32 %v208_v25, %v207_v20  ;;  %v260_v27 = vadd.f32 %v259_v24, %v258_v21 }
  0xbb   :  { %v211_v31 = vadd.f32 %v210_v28, %v209_v26  ;;  %v262_v32 = vadd.f32 %v261_v30, %v260_v27  ;;  %v186_v27 = vld [vmem:[%s3133_s4] sm:$0x1]  ;;  %v349_v30 = vlaneseq  ;;  %s2174_s4 = smov 8  }
  0xbd   :  { %v264_v38 = vadd.f32 %v263_v34, %v262_v32  ;;  %v213_v39 = vadd.f32 %v212_v36, %v211_v31 }
  0xbf   :  { %v215_v45 = vadd.f32 %v214_v42, %v213_v39  ;;  %v266_v46 = vadd.f32 %v265_v41, %v264_v38  ;;  %v2420_v39 = vshrl.u32 %v349_v30, 7 }
  0xc1   :  { %v217_v49 = vadd.f32 %v216_v48, %v215_v45  ;;  %v268_v50 = vadd.f32 %v267_v47, %v266_v46  ;;  %vm386_vm5 = vcmp.le.s32.totalorder %v2420_v39, 6  ;;  %vm351_vm6 = vcmp.ge.s32.totalorder %v2420_v39, 1 }
  0xc3   :  { %v218_v52 = vrot.slane %v217_v49, 4  ;;  %v270_v53 = vadd.f32 %v269_v51, %v268_v50 }
  0xc5   :  { %v219_v54 = vadd.f32 %v218_v52, %v217_v49  ;;  %v271_v55 = vrot.slane %v270_v53, 4 }
  0xc7   :  { %v220_v56 = vrot.slane %v219_v54, 2  ;;  %v272_v57 = vadd.f32 %v271_v55, %v270_v53 }
  0xc9   :  { %v221_v58 = vadd.f32 %v220_v56, %v219_v54  ;;  %v273_v59 = vrot.slane %v272_v57, 2 }
  0xcb   :  { %v222_v61 = vrot.slane %v221_v58, 1  ;;  %v274_v62 = vadd.f32 %v273_v59, %v272_v57 }
  0xcd   :  { %v223_v63 = vadd.f32 %v222_v61, %v221_v58  ;;  %v275_v0 = vrot.slane %v274_v62, 1 }
  0xcf   :  { %v276_v2 = vadd.f32 %v275_v0, %v274_v62  ;;  %v277_v3 = vmul.f32 0.0078125, %v223_v63 }
  0xd1   :  { %v278_v4 = vmul.f32 0.0078125, %v276_v2  ;;  %v279_v5 = vmul.f32 %v277_v3, %v277_v3 }
  0xd3   :  { %v280_v6 = vsub.f32 %v278_v4, %v279_v5 }
  0xd5   :  { %v281_v7 = vadd.f32 1e-05, %v280_v6 }
  0xd7   :  { %2089 = vrsqrt.f32 %v281_v7  ;;  %vm288_vm3 = vweird.f32 %v281_v7 }
  0xdd   :  { %v2090_v8 = vpop.eup %2089 }
  0xde   :  { %v283_v9 = vmul.f32 %v2090_v8, %v281_v7  ;;  %vm289_vm2 = vweird.f32 %v2090_v8 }
  0xdf   :  { %vm290_vm4 = vmor %vm288_vm3, %vm289_vm2  ;;  %vm1729_vm3 = vcmask 1041409  }
  0xe0   :  { %v284_v18 = vmul.f32 %v2090_v8, %v283_v9 }
  0xe2   :  { %v285_v20 = vmul.f32 0.5, %v284_v18 }
  0xe4   :  { %v286_v21 = vsub.f32 1.5, %v285_v20 }
  0xe6   :  { %v287_v24 = vmul.f32 %v2090_v8, %v286_v21 }
  0xe8   :  { %v291_v25 = vsel %vm290_vm4, %v2090_v8, %v287_v24  ;;  %vm1732_vm4 = vcmask 58368  }
  0xe9   :  { %v292_v26 = vmul.f32 %v291_v25, %v185_v22 }
  0xeb   :  { %v293_v28 = vmul.f32 %v292_v26, %v277_v3  ;;  %v2409_v29 = vperm.slane %v292_v26, 0 }
  0xed   :  { %v294_v31 = vsub.f32 %v186_v27, %v293_v28  ;;  %v313_v32 = vmul.f32 %v2409_v29, %v182_v33  ;;  %v299_v36 = vmul.f32 %v2409_v29, %v2300_v12  ;;  %v298_v37 = vmul.f32 %v2409_v29, %v2296_v10 }
  0xee   :  { %v300_v38 = vmul.f32 %v2409_v29, %v2304_v14  ;;  %v301_v12 = vmul.f32 %v2409_v29, %v2308_v16  ;;  %v302_v16 = vmul.f32 %v2409_v29, %v2322_v23  ;;  %v303_v8 = vmul.f32 %v2409_v29, %v2345_v44 }
  0xef   :  { %v2412_v34 = vperm.slane %v294_v31, 0  ;;  %v304_v9 = vmul.f32 %v2409_v29, %v2298_v11 }
  0xf1   :  { %v2423_v41 = vadd.f32 %v2412_v34, %v313_v32  ;;  %v318_v42 = vadd.f32 %v2412_v34, %v299_v36  ;;  %v317_v33 = vadd.f32 %v2412_v34, %v298_v37  ;;  %v319_v43 = vadd.f32 %v2412_v34, %v300_v38 }
  0xf2   :  { %v320_v14 = vadd.f32 %v2412_v34, %v301_v12  ;;  %v321_v55 = vadd.f32 %v2412_v34, %v302_v16  ;;  %v322_v18 = vadd.f32 %v2412_v34, %v303_v8  ;;  %v323_v24 = vadd.f32 %v2412_v34, %v304_v9 }
  0xf3   :  { %v2430_v45 = vmax.f32 %v318_v42, 0.0  ;;  %v2432_v10 = vmax.f32 %v317_v33, 0.0  ;;  %v2434_v46 = vmax.f32 %v319_v43, 0.0  ;;  %v305_v43 = vmul.f32 %v2409_v29, %v2302_v13 }
  0xf4   :  { %v2454_v59 = vmax.f32 %v320_v14, 0.0  ;;  %v2460_v4 = vmax.f32 %v321_v55, 0.0  ;;  %v2479_v30 = vmax.f32 %v322_v18, 0.0  ;;  %v2483_v37 = vmax.f32 %v323_v24, 0.0 }
  0xf5   :  { %v438_v47 = vpack.c.bf16 %v2430_v45, %v2430_v45  ;;  %v437_v48 = vpack.c.bf16 %v2432_v10, %v2432_v10  ;;  %v388_v49 = vrot.slane %v2430_v45, 1  ;;  %v387_v50 = vrot.slane %v2432_v10, 1 }
  0xf6   :  { %v389_v51 = vrot.slane %v2434_v46, 1  ;;  %v439_v57 = vpack.c.bf16 %v2434_v46, %v2434_v46  ;;  %v390_v7 = vrot.slane %v2454_v59, 1  ;;  %v441_v21 = vpack.c.bf16 %v2460_v4, %v2460_v4 }
  0xf7   :  { %v486_v52 = vunpack.c.l.b16 %v438_v47  ;;  %v485_v53 = vunpack.c.l.b16 %v437_v48  ;;  %v406_v54 = vsel %vm386_vm5, %v388_v49, 0.0  ;;  %v405_v58 = vsel %vm386_vm5, %v387_v50, 0.0 }
  0xf8   :  { %v454_v56 = vpack.c.bf16 %v406_v54, %v406_v54  ;;  %v453_v62 = vpack.c.bf16 %v405_v58, %v405_v58  ;;  %v407_v63 = vsel %vm386_vm5, %v389_v51, 0.0  ;;  %v487_v5 = vunpack.c.l.b16 %v439_v57 }
  0xf9   :  { %v502_v23 = vpack.c.b16 %v486_v52, %v486_v52  ;;  %v501_v61 = vpack.c.b16 %v485_v53, %v485_v53  ;;  %v455_v3 = vpack.c.bf16 %v407_v63, %v407_v63  ;;  %v440_v22 = vpack.c.bf16 %v2454_v59, %v2454_v59 }
  0xfa   :  { %v566_v0 = vunpack.c.l.b16 %v454_v56  ;;  %v565_v6 = vunpack.c.l.b16 %v453_v62  ;;  %v503_v25 = vpack.c.b16 %v487_v5, %v487_v5  ;;  %v408_v44 = vsel %vm386_vm5, %v390_v7, 0.0 }
  0xfb   :  { %519 = vrot.lane.b32.xlu1 %v502_v23, %s2173_s3  ;;  %517 = vrot.lane.b32.xlu0 %v501_v61, %s2173_s3  ;;  %v567_v20 = vunpack.c.l.b16 %v455_v3  ;;  %v391_v27 = vrot.slane %v2460_v4, 1  ;;  %v456_v28 = vpack.c.bf16 %v408_v44, %v408_v44  ;;  %v489_v31 = vunpack.c.l.b16 %v441_v21 }
  0xfc   :  { %v582_v2 = vpack.c.b16 %v566_v0, %v566_v0  ;;  %v581_v26 = vpack.c.b16 %v565_v6, %v565_v6  ;;  %v488_v32 = vunpack.c.l.b16 %v440_v22  ;;  %v442_v42 = vpack.c.bf16 %v2479_v30, %v2479_v30 }
  0xfd   :  { %v583_v11 = vpack.c.b16 %v567_v20, %v567_v20  ;;  %v409_v36 = vsel %vm386_vm5, %v391_v27, 0.0  ;;  %v568_v38 = vunpack.c.l.b16 %v456_v28  ;;  %v505_v12 = vpack.c.b16 %v489_v31, %v489_v31 }
  0xfe   :  { %599 = vrot.lane.b32.xlu2 %v582_v2, %s2174_s4  ;;  %v457_v33 = vpack.c.bf16 %v409_v36, %v409_v36  ;;  %v504_v14 = vpack.c.b16 %v488_v32, %v488_v32  ;;  %v393_v47 = vrot.slane %v2483_v37, 1  ;;  %v392_v48 = vrot.slane %v2479_v30, 1 }
  0xff   :  { %v324_v49 = vadd.f32 %v2412_v34, %v305_v43  ;;  %v443_v16 = vpack.c.bf16 %v2483_v37, %v2483_v37  ;;  %v306_v50 = vmul.f32 %v2409_v29, %v2306_v15  ;;  %v584_v51 = vpack.c.b16 %v568_v38, %v568_v38 }
 0x100   :  { %v490_v13 = vunpack.c.l.b16 %v442_v42  ;;  %v569_v52 = vunpack.c.l.b16 %v457_v33  ;;  %v2500_v53 = vmax.f32 %v2423_v41, 0.0  ;;  %v411_v54 = vsel %vm386_vm5, %v393_v47, 0.0 }
 0x101   :  { %v325_v55 = vadd.f32 %v2412_v34, %v306_v50  ;;  %v311_v56 = vmul.f32 %v2409_v29, %v2337_v35  ;;  %v410_v57 = vsel %vm386_vm5, %v392_v48, 0.0  ;;  %v2510_v15 = vmax.f32 %v324_v49, 0.0 }
 0x102   :  { %v312_v58 = vmul.f32 %v2409_v29, %v2363_v60  ;;  %v491_v41 = vunpack.c.l.b16 %v443_v16  ;;  %v506_v61 = vpack.c.b16 %v490_v13, %v490_v13  ;;  %v585_v62 = vpack.c.b16 %v569_v52, %v569_v52 }
 0x103   :  { %521 = vrot.lane.b32.xlu1 %v503_v25, %s2173_s3  ;;  %597 = vrot.lane.b32.xlu0 %v581_v26, %s2174_s4  ;;  %v330_v23 = vadd.f32 %v2412_v34, %v311_v56  ;;  %v459_v63 = vpack.c.bf16 %v411_v54, %v411_v54  ;;  %v458_v2 = vpack.c.bf16 %v410_v57, %v410_v57  ;;  %v2516_v35 = vmax.f32 %v325_v55, 0.0 }
 0x104   :  { %v331_v0 = vadd.f32 %v2412_v34, %v312_v58  ;;  %v402_v5 = vrot.slane %v2500_v53, 1  ;;  %v394_v6 = vrot.slane %v2510_v15, 1  ;;  %v307_v60 = vmul.f32 %v2409_v29, %v2314_v19 }
 0x105   :  { %v2518_v3 = vmax.f32 %v330_v23, 0.0  ;;  %v507_v18 = vpack.c.b16 %v491_v41, %v491_v41  ;;  %v571_v20 = vunpack.c.l.b16 %v459_v63  ;;  %v444_v21 = vpack.c.bf16 %v2510_v15, %v2510_v15 }
 0x106   :  { %601 = vrot.lane.b32.xlu2 %v583_v11, %s2174_s4  ;;  %v2522_v7 = vmax.f32 %v331_v0, 0.0  ;;  %v2531_v9 = vsel %vm386_vm5, %v402_v5, 0.0  ;;  %v570_v24 = vunpack.c.l.b16 %v458_v2  ;;  %v395_v25 = vrot.slane %v2516_v35, 1 }
 0x107   :  { %v400_v8 = vrot.slane %v2518_v3, 1  ;;  %v326_v26 = vadd.f32 %v2412_v34, %v307_v60  ;;  %v412_v44 = vsel %vm386_vm5, %v394_v6, 0.0  ;;  %v308_v27 = vmul.f32 %v2409_v29, %v2342_v40 }
 0x108   :  { %v401_v22 = vrot.slane %v2522_v7, 1  ;;  %v309_v28 = vmul.f32 %v2409_v29, %v2370_v1  ;;  %v587_v31 = vpack.c.b16 %v571_v20, %v571_v20  ;;  %v492_v32 = vunpack.c.l.b16 %v444_v21 }
 0x109   :  { %v2540_v19 = vsel %vm386_vm5, %v400_v8, 0.0  ;;  %v445_v36 = vpack.c.bf16 %v2516_v35, %v2516_v35  ;;  %v327_v38 = vadd.f32 %v2412_v34, %v308_v27  ;;  %v586_v42 = vpack.c.b16 %v570_v24, %v570_v24  ;;  %v1940_v27 = vld [vmem:[%s3134_s5] sm:$0xf] }
 0x10a   :  { %v2549_v11 = vsel %vm386_vm5, %v401_v22, 0.0  ;;  %v460_v33 = vpack.c.bf16 %v412_v44, %v412_v44  ;;  %v413_v43 = vsel %vm386_vm5, %v395_v25, 0.0  ;;  %v2558_v40 = vmax.f32 %v326_v26, 0.0 }
 0x10b   :  { %525 = vrot.lane.b32.xlu1 %v505_v12, %s2173_s3  ;;  %523 = vrot.lane.b32.xlu0 %v504_v14, %s2173_s3  ;;  %v328_v1 = vadd.f32 %v2412_v34, %v309_v28  ;;  %v508_v12 = vpack.c.b16 %v492_v32, %v492_v32  ;;  %v493_v14 = vunpack.c.l.b16 %v445_v36  ;;  %v461_v47 = vpack.c.bf16 %v413_v43, %v413_v43  ;;  %v2021_v28 = vld [vmem:[%s3134_s5] sm:$0x30] }
 0x10c   :  { %v2563_v48 = vmax.f32 %v327_v38, 0.0  ;;  %v572_v49 = vunpack.c.l.b16 %v460_v33  ;;  %v396_v16 = vrot.slane %v2558_v40, 1  ;;  %v365_v50 = vrot.slane %v2518_v3, 7 }
 0x10d   :  { %v509_v13 = vpack.c.b16 %v493_v14, %v493_v14  ;;  %v573_v52 = vunpack.c.l.b16 %v461_v47  ;;  %v310_v55 = vmul.f32 %v2409_v29, %v2310_v17  ;;  %v446_v57 = vpack.c.bf16 %v2558_v40, %v2558_v40 }
 0x10e   :  { %603 = vrot.lane.b32.xlu2 %v584_v51, %s2174_s4  ;;  %v344_v51 = vmax.f32 %v328_v1, 0.0  ;;  %v447_v54 = vpack.c.bf16 %v2563_v48, %v2563_v48  ;;  %v588_v56 = vpack.c.b16 %v572_v49, %v572_v49  ;;  %v414_v58 = vsel %vm386_vm5, %v396_v16, 0.0 }
 0x10f   :  { %v2579_v41 = vsel %vm351_vm6, %v365_v50, 0.0  ;;  %v397_v23 = vrot.slane %v2563_v48, 1  ;;  %v366_v29 = vrot.slane %v2522_v7, 7  ;;  %v462_v63 = vpack.c.bf16 %v414_v58, %v414_v58 }
 0x110   :  { %v363_v17 = vrot.slane %v344_v51, 7  ;;  %v367_v0 = vrot.slane %v2500_v53, 7  ;;  %v495_v2 = vunpack.c.l.b16 %v447_v54  ;;  %v494_v5 = vunpack.c.l.b16 %v446_v57 }
 0x111   :  { %v415_v60 = vsel %vm386_vm5, %v397_v23, 0.0  ;;  %v574_v20 = vunpack.c.l.b16 %v462_v63  ;;  %v448_v24 = vpack.c.bf16 %v344_v51, %v344_v51  ;;  %v398_v44 = vrot.slane %v344_v51, 1 }
 0x112   :  { %v2589_v6 = vsel %vm351_vm6, %v363_v17, 0.0  ;;  %v511_v21 = vpack.c.b16 %v495_v2, %v495_v2  ;;  %v510_v22 = vpack.c.b16 %v494_v5, %v494_v5  ;;  %v463_v25 = vpack.c.bf16 %v415_v60, %v415_v60 }
 0x113   :  { %527 = vrot.lane.b32.xlu1 %v506_v61, %s2173_s3  ;;  %605 = vrot.lane.b32.xlu0 %v585_v62, %s2174_s4  ;;  %v329_v61 = vadd.f32 %v2412_v34, %v310_v55  ;;  %v589_v62 = vpack.c.b16 %v573_v52, %v573_v52  ;;  %v2593_v34 = vsel %vm351_vm6, %v366_v29, 0.0  ;;  %v1941_v36 = vor.u32 %v2021_v28, %v1940_v27 }
 0x114   :  { %v496_v38 = vunpack.c.l.b16 %v448_v24  ;;  %v416_v43 = vsel %vm386_vm5, %v398_v44, 0.0  ;;  %v450_v51 = vpack.c.bf16 %v2518_v3, %v2518_v3  ;;  %v466_v57 = vpack.c.bf16 %v2540_v19, %v2540_v19  ;;  %v2039_v19 = vld [vmem:[%s3134_s5 + $0x10] sm:$0x30]  ;;  %v1896_v24 = vld [vmem:[%s3134_s5 + $0x8] sm:$0xf] }
 0x115   :  { %v2598_v8 = vmax.f32 %v329_v61, 0.0  ;;  %v979_v1 = vsel %vm856_vm7, %v1941_v36, 0  ;;  %v464_v16 = vpack.c.bf16 %v416_v43, %v416_v43  ;;  %v451_v58 = vpack.c.bf16 %v2522_v7, %v2522_v7  ;;  %v1986_v7 = vld [vmem:[%s3134_s5 + $0x10] sm:$0xf] }
 0x116   :  { %529 = vrot.lane.b32.xlu2 %v507_v18, %s2173_s3  ;;  %v2602_v18 = vsel %vm351_vm6, %v367_v0, 0.0  ;;  %988 = vmatpush.bf16.msrb.mxu2 %v979_v1  ;;  %v512_v14 = vpack.c.b16 %v496_v38, %v496_v38  ;;  %v498_v54 = vunpack.c.l.b16 %v450_v51  ;;  %v467_v3 = vpack.c.bf16 %v2549_v11, %v2549_v11 }
 0x117   :  { %v399_v26 = vrot.slane %v2598_v8, 1  ;;  %v449_v32 = vpack.c.bf16 %v2598_v8, %v2598_v8  ;;  %v576_v52 = vunpack.c.l.b16 %v464_v16  ;;  %v578_v61 = vunpack.c.l.b16 %v466_v57 }
 0x118   :  { %v514_v23 = vpack.c.b16 %v498_v54, %v498_v54  ;;  %v499_v17 = vunpack.c.l.b16 %v451_v58  ;;  %v579_v29 = vunpack.c.l.b16 %v467_v3  ;;  %v468_v11 = vpack.c.bf16 %v2531_v9, %v2531_v9 }
 0x119   :  { %v417_v33 = vsel %vm386_vm5, %v399_v26, 0.0  ;;  %v594_v63 = vpack.c.b16 %v578_v61, %v578_v61  ;;  %v1987_v2 = vor.u32 %v2039_v19, %v1986_v7  ;;  %v2175_v44 = vmov 0  }
 0x11a   :  { %v465_v49 = vpack.c.bf16 %v417_v33, %v417_v33  ;;  %v515_v0 = vpack.c.b16 %v499_v17, %v499_v17  ;;  %v595_v5 = vpack.c.b16 %v579_v29, %v579_v29  ;;  %v580_v60 = vunpack.c.l.b16 %v468_v11  ;;  %727 = vst.msk [vmem:[#allocation2] sm:$0xf] %vm726_vm8, %v2175_v44 }
 0x11b   :  { %609 = vrot.lane.b32.xlu1 %v587_v31, %s2174_s4  ;;  %607 = vrot.lane.b32.xlu0 %v586_v42, %s2174_s4  ;;  %v590_v31 = vpack.c.b16 %v574_v20, %v574_v20  ;;  %v575_v42 = vunpack.c.l.b16 %v463_v25  ;;  %v2030_v25 = vld [vmem:[%s3134_s5 + $0x8] sm:$0x30]  ;;  %728 = vst.msk [vmem:[#allocation2 + $0x28] sm:$0xf] %vm726_vm8, %v2175_v44  ;;  %v353_v28 = vrot.slane %v2430_v45, 7  ;;  %v352_v38 = vrot.slane %v2432_v10, 7 }
 0x11c   :  { %v1897_v26 = vor.u32 %v2030_v25, %v1896_v24  ;;  %730 = vst.msk [vmem:[#allocation2 + $0x24] sm:$0xf] %vm726_vm8, %v2175_v44  ;;  %v354_v43 = vrot.slane %v2434_v46, 7  ;;  %v355_v46 = vrot.slane %v2454_v59, 7  ;;  %v356_v57 = vrot.slane %v2460_v4, 7 }
 0x11d   :  { %v591_v47 = vpack.c.b16 %v575_v42, %v575_v42  ;;  %731 = vst.msk [vmem:[#allocation2 + $0x4c] sm:$0xf] %vm726_vm8, %v2175_v44  ;;  %v370_v45 = vsel %vm351_vm6, %v352_v38, 0.0  ;;  %v358_v19 = vrot.slane %v2483_v37, 7  ;;  %v359_v37 = vrot.slane %v2510_v15, 7 }
 0x11e   :  { %531 = vrot.lane.b32.xlu2 %v508_v12, %s2173_s3  ;;  %v497_v12 = vunpack.c.l.b16 %v449_v32  ;;  %v858_v27 = vsel %vm856_vm7, %v1897_v26, 0  ;;  %v371_v32 = vsel %vm351_vm6, %v353_v28, 0.0  ;;  %v374_v7 = vsel %vm351_vm6, %v356_v57, 0.0 }
 0x11f   :  { %867 = vmatpush.bf16.msra.mxu1 %v858_v27  ;;  %v422_v36 = vpack.c.bf16 %v371_v32, %v371_v32  ;;  %v425_v4 = vpack.c.bf16 %v374_v7, %v374_v7  ;;  %v360_v26 = vrot.slane %v2516_v35, 7  ;;  %v377_v15 = vsel %vm351_vm6, %v359_v37, 0.0 }
 0x120   :  { %v513_v50 = vpack.c.b16 %v497_v12, %v497_v12  ;;  %v428_v38 = vpack.c.bf16 %v377_v15, %v377_v15 }
 0x121   :  { %v378_v35 = vsel %vm351_vm6, %v360_v26, 0.0 }
 0x123   :  { %533 = vrot.lane.b32.xlu1 %v509_v13, %s2173_s3  ;;  %611 = vrot.lane.b32.xlu0 %v588_v56, %s2174_s4  ;;  %v577_v13 = vunpack.c.l.b16 %v465_v49  ;;  %v592_v56 = vpack.c.b16 %v576_v52, %v576_v52  ;;  %v421_v49 = vpack.c.bf16 %v370_v45, %v370_v45 }
 0x125   :  { %v593_v55 = vpack.c.b16 %v577_v13, %v577_v13 }
 0x126   :  { %613 = vrot.lane.b32.xlu2 %v589_v62, %s2174_s4  ;;  %v452_v62 = vpack.c.bf16 %v2500_v53, %v2500_v53  ;;  %v1120_v53 = vsel %vm856_vm7, %v1987_v2, 0 }
 0x127   :  { %1129 = vmatpush.bf16.msrb.mxu3 %v1120_v53 }
 0x128   :  { %v500_v20 = vunpack.c.l.b16 %v452_v62 }
 0x12b   :  { %537 = vrot.lane.b32.xlu1 %v511_v21, %s2173_s3  ;;  %535 = vrot.lane.b32.xlu0 %v510_v22, %s2173_s3  ;;  %v596_v21 = vpack.c.b16 %v580_v60, %v580_v60  ;;  %v516_v22 = vpack.c.b16 %v500_v20, %v500_v20  ;;  %v376_v60 = vsel %vm351_vm6, %v358_v19, 0.0 }
 0x12e   :  { %615 = vrot.lane.b32.xlu2 %v590_v31, %s2174_s4 }
 0x133   :  { %539 = vrot.lane.b32.xlu1 %v512_v14, %s2173_s3  ;;  %617 = vrot.lane.b32.xlu0 %v591_v47, %s2174_s4  ;;  %v372_v47 = vsel %vm351_vm6, %v354_v43, 0.0 }
 0x134   :  { %v423_v16 = vpack.c.bf16 %v372_v47, %v372_v47 }
 0x136   :  { %541 = vrot.lane.b32.xlu2 %v513_v50, %s2173_s3 }
 0x13b   :  { %621 = vrot.lane.b32.xlu1 %v593_v55, %s2174_s4  ;;  %619 = vrot.lane.b32.xlu0 %v592_v56, %s2174_s4  ;;  %v373_v55 = vsel %vm351_vm6, %v355_v46, 0.0 }
 0x13c   :  { %v424_v58 = vpack.c.bf16 %v373_v55, %v373_v55 }
 0x13e   :  { %543 = vrot.lane.b32.xlu2 %v514_v23, %s2173_s3 }
 0x143   :  { %623 = vrot.lane.b32.xlu1 %v594_v63, %s2174_s4  ;;  %545 = vrot.lane.b32.xlu0 %v515_v0, %s2173_s3  ;;  %v357_v0 = vrot.slane %v2479_v30, 7 }
 0x145   :  { %v375_v20 = vsel %vm351_vm6, %v357_v0, 0.0 }
 0x146   :  { %625 = vrot.lane.b32.xlu2 %v595_v5, %s2174_s4 }
 0x14b   :  { %627 = vrot.lane.b32.xlu1 %v596_v21, %s2174_s4  ;;  %547 = vrot.lane.b32.xlu0 %v516_v22, %s2173_s3  ;;  %v427_v21 = vpack.c.bf16 %v376_v60, %v376_v60  ;;  %v426_v22 = vpack.c.bf16 %v375_v20, %v375_v20  ;;  %s1791_s4 = sshll.u32 %s3143_s14, 4  ;;  %s1792_s4 = int_to_ptr.hbm [resolvable:$true] %s1791_s4 }
 0x158   :  { %v600_v9 = vpop.permute.xlu2 %599 }
 0x160   :  { %v602_v31 = vpop.permute.xlu2 %601 }
 0x168   :  { %v604_v14 = vpop.permute.xlu2 %603 }
 0x16d   :  { %v520_v42 = vpop.permute.xlu1 %519  ;;  %v518_v33 = vpop.permute.xlu0 %517 }
 0x16e   :  { %v634_v1 = vsel %vm107_vm1, %v422_v36, %v520_v42  ;;  %v631_v10 = vsel %vm107_vm1, %v421_v49, %v518_v33  ;;  %v429_v42 = vpack.c.bf16 %v378_v35, %v378_v35 }
 0x16f   :  { %v682_v12 = vsel %vm677_vm9, %v634_v1, %v600_v9 }
 0x170   :  { %734 = vst.msk [vmem:[#allocation2 + $0x8] sm:$0xf] %vm726_vm8, %v682_v12  ;;  %v530_v56 = vpop.permute.xlu2 %529  ;;  %v361_v12 = vrot.slane %v2558_v40, 7 }
 0x171   :  { %v649_v30 = vsel %vm107_vm1, %v427_v21, %v530_v56 }
 0x175   :  { %v522_v50 = vpop.permute.xlu1 %521  ;;  %v598_v51 = vpop.permute.xlu0 %597 }
 0x176   :  { %v637_v13 = vsel %vm107_vm1, %v423_v16, %v522_v50  ;;  %v679_v52 = vsel %vm677_vm9, %v631_v10, %v598_v51  ;;  %v379_v16 = vsel %vm351_vm6, %v361_v12, 0.0  ;;  %v362_v10 = vrot.slane %v2563_v48, 7 }
 0x177   :  { %v685_v54 = vsel %vm677_vm9, %v637_v13, %v602_v31  ;;  %733 = vst.msk [vmem:[#allocation2 + $0x4] sm:$0xf] %vm726_vm8, %v679_v52  ;;  %v430_v50 = vpack.c.bf16 %v379_v16, %v379_v16 }
 0x178   :  { %735 = vst.msk [vmem:[#allocation2 + $0xc] sm:$0xf] %vm726_vm8, %v685_v54  ;;  %v532_v63 = vpop.permute.xlu2 %531  ;;  %v380_v56 = vsel %vm351_vm6, %v362_v10, 0.0 }
 0x179   :  { %v652_v33 = vsel %vm107_vm1, %v428_v38, %v532_v63  ;;  %v431_v57 = vpack.c.bf16 %v380_v56, %v380_v56 }
 0x17d   :  { %v526_v23 = vpop.permute.xlu1 %525  ;;  %v524_v3 = vpop.permute.xlu0 %523 }
 0x17e   :  { %v640_v59 = vsel %vm107_vm1, %v424_v58, %v524_v3  ;;  %v2022_v61 = vld [vmem:[#allocation2 + $0x4] sm:$0xff]  ;;  %v643_v11 = vsel %vm107_vm1, %v425_v4, %v526_v23  ;;  %v364_v58 = vrot.slane %v2598_v8, 7 }
 0x17f   :  { %v2013_v17 = vld [vmem:[#allocation2] sm:$0xff]  ;;  %v688_v29 = vsel %vm677_vm9, %v640_v59, %v604_v14  ;;  %v2031_v62 = vld [vmem:[#allocation2 + $0x8] sm:$0xff]  ;;  %1898 = vmatmul.msk.bf16.vlgmr.msra.gmra.mxu1 %vm831_vm10, %v2022_v61 }
 0x180   :  { %736 = vst.msk [vmem:[#allocation2 + $0x10] sm:$0xf] %vm726_vm8, %v688_v29  ;;  %1942 = vmatmul.msk.bf16.vlgmr.msrb.gmra.mxu2 %vm831_vm10, %v2013_v17  ;;  %1988 = vmatmul.msk.bf16.vlgmr.msrb.gmra.mxu3 %vm831_vm10, %v2031_v62  ;;  %v614_v44 = vpop.permute.xlu2 %613  ;;  %v2014_v32 = vld [vmem:[#allocation2 + $0x8] sm:$0xff]  ;;  %v382_v17 = vsel %vm351_vm6, %v364_v58, 0.0  ;;  %v432_v62 = vpack.c.bf16 %v2589_v6, %v2589_v6  ;;  %v434_v6 = vpack.c.bf16 %v2579_v41, %v2579_v41 }
 0x181   :  { %v433_v29 = vpack.c.bf16 %v382_v17, %v382_v17  ;;  %v436_v41 = vpack.c.bf16 %v2602_v18, %v2602_v18 }
 0x185   :  { %v528_v2 = vpop.permute.xlu1 %527  ;;  %v606_v53 = vpop.permute.xlu0 %605 }
 0x186   :  { %v691_v5 = vsel %vm677_vm9, %v643_v11, %v606_v53  ;;  %v646_v9 = vsel %vm107_vm1, %v426_v22, %v528_v2 }
 0x187   :  { %737 = vst.msk [vmem:[#allocation2 + $0x14] sm:$0xf] %vm726_vm8, %v691_v5  ;;  %v2023_v31 = vld [vmem:[#allocation2 + $0xc] sm:$0xff]  ;;  %v435_v5 = vpack.c.bf16 %v2593_v34, %v2593_v34 }
 0x188   :  { %v616_v49 = vpop.permute.xlu2 %615 }
 0x18d   :  { %v610_v24 = vpop.permute.xlu1 %609  ;;  %v608_v25 = vpop.permute.xlu0 %607 }
 0x18e   :  { %v697_v27 = vsel %vm677_vm9, %v649_v30, %v610_v24  ;;  %v694_v28 = vsel %vm677_vm9, %v646_v9, %v608_v25  ;;  %v2032_v36 = vld [vmem:[#allocation2 + $0x10] sm:$0xff] }
 0x18f   :  { %739 = vst.msk [vmem:[#allocation2 + $0x1c] sm:$0xf] %vm726_vm8, %v697_v27  ;;  %1899 = vmatmul.msk.bf16.gmra.mxu1 %vm831_vm10, %v2023_v31  ;;  %v2015_v52 = vld [vmem:[#allocation2 + $0x10] sm:$0xff] }
 0x190   :  { %738 = vst.msk [vmem:[#allocation2 + $0x18] sm:$0xf] %vm726_vm8, %v694_v28  ;;  %1943 = vmatmul.msk.bf16.gmra.mxu2 %vm831_vm10, %v2014_v32  ;;  %1989 = vmatmul.msk.bf16.gmra.mxu3 %vm831_vm10, %v2032_v36  ;;  %v542_v48 = vpop.permute.xlu2 %541 }
 0x191   :  { %v667_v4 = vsel %vm107_vm1, %v433_v29, %v542_v48 }
 0x195   :  { %v534_v43 = vpop.permute.xlu1 %533  ;;  %v612_v1 = vpop.permute.xlu0 %611 }
 0x196   :  { %v655_v14 = vsel %vm107_vm1, %v429_v42, %v534_v43  ;;  %v700_v45 = vsel %vm677_vm9, %v652_v33, %v612_v1 }
 0x197   :  { %v703_v47 = vsel %vm677_vm9, %v655_v14, %v614_v44  ;;  %740 = vst.msk [vmem:[#allocation2 + $0x20] sm:$0xf] %vm726_vm8, %v700_v45  ;;  %v2024_v13 = vld [vmem:[#allocation2 + $0x14] sm:$0xff] }
 0x198   :  { %741 = vst.msk [vmem:[#allocation2 + $0x2c] sm:$0xf] %vm726_vm8, %v703_v47  ;;  %v2033_v55 = vld [vmem:[#allocation2 + $0x18] sm:$0xff]  ;;  %v544_v7 = vpop.permute.xlu2 %543 }
 0x199   :  { %v2016_v53 = vld [vmem:[#allocation2 + $0x18] sm:$0xff]  ;;  %v670_v60 = vsel %vm107_vm1, %v434_v6, %v544_v7 }
 0x19d   :  { %v538_v51 = vpop.permute.xlu1 %537  ;;  %v536_v46 = vpop.permute.xlu0 %535 }
 0x19e   :  { %v658_v40 = vsel %vm107_vm1, %v430_v50, %v536_v46  ;;  %v661_v23 = vsel %vm107_vm1, %v431_v57, %v538_v51  ;;  %v2025_v2 = vld [vmem:[#allocation2 + $0x1c] sm:$0xff] }
 0x19f   :  { %v706_v54 = vsel %vm677_vm9, %v658_v40, %v616_v49  ;;  %1900 = vmatmul.msk.bf16.gmra.mxu1 %vm831_vm10, %v2024_v13  ;;  %v2034_v39 = vld [vmem:[#allocation2 + $0x20] sm:$0xff]  ;;  %v2017_v44 = vld [vmem:[#allocation2 + $0x28] sm:$0xff] }
 0x1a0   :  { %742 = vst.msk [vmem:[#allocation2 + $0x30] sm:$0xf] %vm726_vm8, %v706_v54  ;;  %1944 = vmatmul.msk.bf16.gmra.mxu2 %vm831_vm10, %v2015_v52  ;;  %1990 = vmatmul.msk.bf16.gmra.mxu3 %vm831_vm10, %v2033_v55  ;;  %v626_v22 = vpop.permute.xlu2 %625 }
 0x1a5   :  { %v540_v3 = vpop.permute.xlu1 %539  ;;  %v618_v59 = vpop.permute.xlu0 %617 }
 0x1a6   :  { %v709_v61 = vsel %vm677_vm9, %v661_v23, %v618_v59  ;;  %v664_v8 = vsel %vm107_vm1, %v432_v62, %v540_v3 }
 0x1a7   :  { %743 = vst.msk [vmem:[#allocation2 + $0x34] sm:$0xf] %vm726_vm8, %v709_v61  ;;  %v2026_v26 = vld [vmem:[#allocation2 + $0x2c] sm:$0xff] }
 0x1ad   :  { %v622_v19 = vpop.permute.xlu1 %621  ;;  %v620_v63 = vpop.permute.xlu0 %619 }
 0x1ae   :  { %v715_v0 = vsel %vm677_vm9, %v667_v4, %v622_v19  ;;  %v712_v11 = vsel %vm677_vm9, %v664_v8, %v620_v63  ;;  %v2035_v28 = vld [vmem:[#allocation2 + $0x30] sm:$0xff] }
 0x1af   :  { %745 = vst.msk [vmem:[#allocation2 + $0x3c] sm:$0xf] %vm726_vm8, %v715_v0  ;;  %1901 = vmatmul.msk.bf16.gmra.mxu1 %vm831_vm10, %v2025_v2  ;;  %v2018_v32 = vld [vmem:[#allocation2 + $0x30] sm:$0xff] }
 0x1b0   :  { %744 = vst.msk [vmem:[#allocation2 + $0x38] sm:$0xf] %vm726_vm8, %v712_v11  ;;  %1945 = vmatmul.msk.bf16.gmra.mxu2 %vm831_vm10, %v2016_v53  ;;  %1991 = vmatmul.msk.bf16.gmra.mxu3 %vm831_vm10, %v2034_v39 }
 0x1b5   :  { %v624_v20 = vpop.permute.xlu1 %623  ;;  %v546_v21 = vpop.permute.xlu0 %545 }
 0x1b6   :  { %v718_v37 = vsel %vm677_vm9, %v670_v60, %v624_v20  ;;  %v673_v30 = vsel %vm107_vm1, %v435_v5, %v546_v21 }
 0x1b7   :  { %746 = vst.msk [vmem:[#allocation2 + $0x40] sm:$0xf] %vm726_vm8, %v718_v37  ;;  %v721_v9 = vsel %vm677_vm9, %v673_v30, %v626_v22  ;;  %v2027_v31 = vld [vmem:[#allocation2 + $0x34] sm:$0xff] }
 0x1b8   :  { %747 = vst.msk [vmem:[#allocation2 + $0x44] sm:$0xf] %vm726_vm8, %v721_v9  ;;  %v2036_v18 = vld [vmem:[#allocation2 + $0x38] sm:$0xff] }
 0x1b9   :  { %v2019_v15 = vld [vmem:[#allocation2 + $0x38] sm:$0xff] }
 0x1bd   :  { %v628_v24 = vpop.permute.xlu1 %627  ;;  %v548_v34 = vpop.permute.xlu0 %547 }
 0x1be   :  { %v676_v25 = vsel %vm107_vm1, %v436_v41, %v548_v34  ;;  %v2028_v36 = vld [vmem:[#allocation2 + $0x3c] sm:$0xff] }
 0x1bf   :  { %v724_v27 = vsel %vm677_vm9, %v676_v25, %v628_v24  ;;  %1902 = vmatmul.msk.bf16.gmra.mxu1 %vm831_vm10, %v2026_v26  ;;  %v2037_v35 = vld [vmem:[#allocation2 + $0x40] sm:$0xff] }
 0x1c0   :  { %748 = vst.msk [vmem:[#allocation2 + $0x48] sm:$0xf] %vm726_vm8, %v724_v27  ;;  %1946 = vmatmul.msk.bf16.gmra.mxu2 %vm831_vm10, %v2017_v44  ;;  %1992 = vmatmul.msk.bf16.gmra.mxu3 %vm831_vm10, %v2035_v28  ;;  %v2020_v42 = vld [vmem:[#allocation2 + $0x40] sm:$0xff] }
 0x1c7   :  { %v2029_v38 = vld [vmem:[#allocation2 + $0x44] sm:$0xff] }
 0x1c8   :  { %v2038_v33 = vld [vmem:[#allocation2 + $0x48] sm:$0xff] }
 0x1cf   :  { %1903 = vmatmul.msk.bf16.gmra.mxu1 %vm831_vm10, %v2027_v31 }
 0x1d0   :  { %1947 = vmatmul.msk.bf16.gmra.mxu2 %vm831_vm10, %v2018_v32  ;;  %1993 = vmatmul.msk.bf16.gmra.mxu3 %vm831_vm10, %v2036_v18 }
 0x1df   :  { %1904 = vmatmul.msk.bf16.gmra.mxu1 %vm831_vm10, %v2028_v36 }
 0x1e0   :  { %1948 = vmatmul.msk.bf16.gmra.mxu2 %vm831_vm10, %v2019_v15  ;;  %1994 = vmatmul.msk.bf16.gmra.mxu3 %vm831_vm10, %v2037_v35 }
 0x1ef   :  { %1905 = vmatmul.msk.bf16.gmra.mxu1 %vm831_vm10, %v2029_v38 }
 0x1f0   :  { %1949 = vmatmul.msk.bf16.gmra.mxu2 %vm831_vm10, %v2020_v42  ;;  %1995 = vmatmul.msk.bf16.gmra.mxu3 %vm831_vm10, %v2038_v33 }
 0x1fc   :  { %v869_v43 = vpop.f32.mrf.mxu1 }
 0x203   :  { %v990_v1 = vpop.f32.mrf.mxu2  ;;  %v1131_v14 = vpop.f32.mrf.mxu3 }
 0x204   :  { %v991_v12 = vadd.f32 %v990_v1, %v869_v43  ;;  %v871_v45 = vpop.f32.mrf.mxu1 }
 0x206   :  { %v2778_v47 = vadd.f32 %v1131_v14, %v991_v12 }
 0x208   :  { %v1226_v34 = vmul.f32 %v2778_v47, %v2778_v47  ;;  %v1189_v27 = vsel %vm107_vm1, %v2778_v47, 0.0 }
 0x20a   :  { %v1242_v38 = vsel %vm107_vm1, %v1226_v34, 0.0 }
 0x20b   :  { %v992_v49 = vpop.f32.mrf.mxu2  ;;  %v1133_v10 = vpop.f32.mrf.mxu3 }
 0x20c   :  { %v993_v16 = vadd.f32 %v992_v49, %v871_v45  ;;  %v874_v50 = vpop.f32.mrf.mxu1 }
 0x20e   :  { %v2780_v51 = vadd.f32 %v1133_v10, %v993_v16 }
 0x210   :  { %v1227_v41 = vmul.f32 %v2780_v51, %v2780_v51  ;;  %v1190_v26 = vsel %vm107_vm1, %v2780_v51, 0.0 }
 0x211   :  { %v1191_v42 = vadd.f32 %v1190_v26, %v1189_v27 }
 0x212   :  { %v1243_v28 = vsel %vm107_vm1, %v1227_v41, 0.0 }
 0x213   :  { %v995_v46 = vpop.f32.mrf.mxu2  ;;  %v1136_v13 = vpop.f32.mrf.mxu3  ;;  %v1244_v45 = vadd.f32 %v1243_v28, %v1242_v38 }
 0x214   :  { %v996_v40 = vadd.f32 %v995_v46, %v874_v50  ;;  %v876_v52 = vpop.f32.mrf.mxu1 }
 0x216   :  { %v2782_v54 = vadd.f32 %v1136_v13, %v996_v40 }
 0x218   :  { %v1228_v44 = vmul.f32 %v2782_v54, %v2782_v54  ;;  %v1192_v32 = vsel %vm107_vm1, %v2782_v54, 0.0 }
 0x219   :  { %v1193_v49 = vadd.f32 %v1192_v32, %v1191_v42 }
 0x21a   :  { %v1245_v43 = vsel %vm107_vm1, %v1228_v44, 0.0 }
 0x21b   :  { %v997_v55 = vpop.f32.mrf.mxu2  ;;  %v1138_v48 = vpop.f32.mrf.mxu3 }
 0x21c   :  { %v998_v56 = vadd.f32 %v997_v55, %v876_v52  ;;  %v879_v57 = vpop.f32.mrf.mxu1  ;;  %v1246_v52 = vadd.f32 %v1245_v43, %v1244_v45 }
 0x21e   :  { %v2784_v58 = vadd.f32 %v1138_v48, %v998_v56 }
 0x220   :  { %v1229_v18 = vmul.f32 %v2784_v58, %v2784_v58  ;;  %v1194_v1 = vsel %vm107_vm1, %v2784_v58, 0.0 }
 0x221   :  { %v1195_v55 = vadd.f32 %v1194_v1, %v1193_v49 }
 0x222   :  { %v1247_v50 = vsel %vm107_vm1, %v1229_v18, 0.0 }
 0x223   :  { %v1000_v23 = vpop.f32.mrf.mxu2  ;;  %v1141_v59 = vpop.f32.mrf.mxu3 }
 0x224   :  { %v1001_v3 = vadd.f32 %v1000_v23, %v879_v57  ;;  %v881_v61 = vpop.f32.mrf.mxu1 }
 0x226   :  { %v2786_v17 = vadd.f32 %v1141_v59, %v1001_v3  ;;  %v1248_v59 = vadd.f32 %v1247_v50, %v1246_v52 }
 0x228   :  { %v1230_v12 = vmul.f32 %v2786_v17, %v2786_v17  ;;  %v1196_v46 = vsel %vm107_vm1, %v2786_v17, 0.0 }
 0x22a   :  { %v1249_v48 = vsel %vm107_vm1, %v1230_v12, 0.0 }
 0x22b   :  { %v1002_v29 = vpop.f32.mrf.mxu2  ;;  %v1143_v62 = vpop.f32.mrf.mxu3 }
 0x22c   :  { %v884_v7 = vpop.f32.mrf.mxu1  ;;  %v1003_v24 = vadd.f32 %v1002_v29, %v881_v61  ;;  %v1197_v61 = vadd.f32 %v1196_v46, %v1195_v55 }
 0x22e   :  { %v2803_v36 = vadd.f32 %v1143_v62, %v1003_v24 }
 0x230   :  { %v1231_v40 = vmul.f32 %v2803_v36, %v2803_v36  ;;  %v1198_v57 = vsel %vm107_vm1, %v2803_v36, 0.0 }
 0x233   :  { %v1005_v4 = vpop.f32.mrf.mxu2  ;;  %v1146_v8 = vpop.f32.mrf.mxu3 }
 0x234   :  { %v886_v19 = vpop.f32.mrf.mxu1  ;;  %v1006_v25 = vadd.f32 %v1005_v4, %v884_v7  ;;  %v1251_v7 = vsel %vm107_vm1, %v1231_v40, 0.0 }
 0x236   :  { %v2806_v33 = vadd.f32 %v1146_v8, %v1006_v25 }
 0x238   :  { %v1232_v56 = vmul.f32 %v2806_v33, %v2806_v33  ;;  %v1200_v4 = vsel %vm107_vm1, %v2806_v33, 0.0 }
 0x23b   :  { %v1007_v63 = vpop.f32.mrf.mxu2  ;;  %v1148_v0 = vpop.f32.mrf.mxu3 }
 0x23c   :  { %v889_v11 = vpop.f32.mrf.mxu1  ;;  %v1008_v15 = vadd.f32 %v1007_v63, %v886_v19 }
 0x23e   :  { %v2818_v13 = vadd.f32 %v1148_v0, %v1008_v15  ;;  %v1250_v0 = vadd.f32 %v1249_v48, %v1248_v59 }
 0x240   :  { %v1233_v8 = vmul.f32 %v2818_v13, %v2818_v13 }
 0x243   :  { %v1010_v2 = vpop.f32.mrf.mxu2  ;;  %v1151_v53 = vpop.f32.mrf.mxu3 }
 0x244   :  { %v891_v39 = vpop.f32.mrf.mxu1  ;;  %v1011_v14 = vadd.f32 %v1010_v2, %v889_v11  ;;  %v1199_v11 = vadd.f32 %v1198_v57, %v1197_v61  ;;  %v1253_v2 = vsel %vm107_vm1, %v1232_v56, 0.0 }
 0x246   :  { %v2825_v23 = vadd.f32 %v1151_v53, %v1011_v14  ;;  %v1202_v53 = vsel %vm107_vm1, %v2818_v13, 0.0 }
 0x24b   :  { %v1012_v6 = vpop.f32.mrf.mxu2  ;;  %v1153_v5 = vpop.f32.mrf.mxu3 }
 0x24c   :  { %v894_v60 = vpop.f32.mrf.mxu1  ;;  %v1013_v16 = vadd.f32 %v1012_v6, %v891_v39  ;;  %v1234_v39 = vmul.f32 %v2825_v23, %v2825_v23 }
 0x24e   :  { %v2827_v29 = vadd.f32 %v1153_v5, %v1013_v16 }
 0x250   :  { %v1235_v41 = vmul.f32 %v2827_v29, %v2827_v29 }
 0x252   :  { %v1259_v18 = vsel %vm107_vm1, %v1235_v41, 0.0 }
 0x253   :  { %v1015_v20 = vpop.f32.mrf.mxu2  ;;  %v1156_v21 = vpop.f32.mrf.mxu3 }
 0x254   :  { %v896_v22 = vpop.f32.mrf.mxu1  ;;  %v1016_v3 = vadd.f32 %v1015_v20, %v894_v60  ;;  %v1252_v60 = vadd.f32 %v1251_v7, %v1250_v0  ;;  %v1201_v20 = vadd.f32 %v1200_v4, %v1199_v11 }
 0x256   :  { %v2839_v6 = vadd.f32 %v1156_v21, %v1016_v3  ;;  %v1254_v25 = vadd.f32 %v1253_v2, %v1252_v60  ;;  %v1203_v26 = vadd.f32 %v1202_v53, %v1201_v20  ;;  %v1257_v21 = vsel %vm107_vm1, %v1234_v39, 0.0 }
 0x258   :  { %v1236_v27 = vmul.f32 %v2839_v6, %v2839_v6  ;;  %v1208_v15 = vsel %vm107_vm1, %v2839_v6, 0.0 }
 0x25b   :  { %v1017_v37 = vpop.f32.mrf.mxu2  ;;  %v1158_v30 = vpop.f32.mrf.mxu3 }
 0x25c   :  { %v899_v9 = vpop.f32.mrf.mxu1  ;;  %v1018_v19 = vadd.f32 %v1017_v37, %v896_v22  ;;  %v1255_v22 = vsel %vm107_vm1, %v1233_v8, 0.0  ;;  %v1204_v37 = vsel %vm107_vm1, %v2825_v23, 0.0 }
 0x25d   :  { %v1205_v32 = vadd.f32 %v1204_v37, %v1203_v26 }
 0x25e   :  { %v2846_v24 = vadd.f32 %v1158_v30, %v1018_v19 }
 0x260   :  { %v1237_v38 = vmul.f32 %v2846_v24, %v2846_v24  ;;  %v1210_v45 = vsel %vm107_vm1, %v2846_v24, 0.0 }
 0x262   :  { %v1263_v46 = vsel %vm107_vm1, %v1237_v38, 0.0 }
 0x263   :  { %v1020_v31 = vpop.f32.mrf.mxu2  ;;  %v1161_v35 = vpop.f32.mrf.mxu3 }
 0x264   :  { %v901_v10 = vpop.f32.mrf.mxu1  ;;  %v1021_v5 = vadd.f32 %v1020_v31, %v899_v9  ;;  %v1206_v9 = vsel %vm107_vm1, %v2827_v29, 0.0  ;;  %v1256_v31 = vadd.f32 %v1255_v22, %v1254_v25 }
 0x265   :  { %v1207_v14 = vadd.f32 %v1206_v9, %v1205_v32 }
 0x266   :  { %v2853_v28 = vadd.f32 %v1161_v35, %v1021_v5  ;;  %v1258_v12 = vadd.f32 %v1257_v21, %v1256_v31  ;;  %v1261_v35 = vsel %vm107_vm1, %v1236_v27, 0.0 }
 0x267   :  { %v1209_v50 = vadd.f32 %v1208_v15, %v1207_v14 }
 0x268   :  { %v1238_v49 = vmul.f32 %v2853_v28, %v2853_v28  ;;  %v1212_v40 = vsel %vm107_vm1, %v2853_v28, 0.0 }
 0x269   :  { %v1211_v56 = vadd.f32 %v1210_v45, %v1209_v50 }
 0x26a   :  { %v1265_v48 = vsel %vm107_vm1, %v1238_v49, 0.0 }
 0x26b   :  { %v1022_v62 = vpop.f32.mrf.mxu2  ;;  %v1163_v63 = vpop.f32.mrf.mxu3  ;;  %v1213_v61 = vadd.f32 %v1212_v40, %v1211_v56 }
 0x26c   :  { %v1023_v34 = vadd.f32 %v1022_v62, %v901_v10  ;;  %v904_v44 = vpop.f32.mrf.mxu1  ;;  %v1260_v10 = vadd.f32 %v1259_v18, %v1258_v12 }
 0x26e   :  { %v2860_v42 = vadd.f32 %v1163_v63, %v1023_v34  ;;  %v1262_v55 = vadd.f32 %v1261_v35, %v1260_v10 }
 0x270   :  { %v1239_v52 = vmul.f32 %v2860_v42, %v2860_v42  ;;  %v1214_v57 = vsel %vm107_vm1, %v2860_v42, 0.0  ;;  %v1264_v59 = vadd.f32 %v1263_v46, %v1262_v55  ;;  %v1187_v55 = vld [vmem:[%s3135_s6] sm:$0x1] }
 0x271   :  { %v1215_v11 = vadd.f32 %v1214_v57, %v1213_v61 }
 0x272   :  { %v1267_v4 = vsel %vm107_vm1, %v1239_v52, 0.0  ;;  %v1266_v0 = vadd.f32 %v1265_v48, %v1264_v59 }
 0x273   :  { %v1025_v30 = vpop.f32.mrf.mxu2  ;;  %v1166_v1 = vpop.f32.mrf.mxu3 }
 0x274   :  { %v1026_v43 = vadd.f32 %v1025_v30, %v904_v44  ;;  %v906_v62 = vpop.f32.mrf.mxu1  ;;  %v1268_v39 = vadd.f32 %v1267_v4, %v1266_v0 }
 0x276   :  { %v2867_v16 = vadd.f32 %v1166_v1, %v1026_v43  ;;  %v1359_v1 = vld [vmem:[%s3137_s8] sm:$0x3] }
 0x277   :  { %v1385_v12 = vsel %vm132_vm0, %v1359_v1, 0 }
 0x278   :  { %v1240_v3 = vmul.f32 %v2867_v16, %v2867_v16  ;;  %v1216_v8 = vsel %vm107_vm1, %v2867_v16, 0.0  ;;  %1394 = vmatpush.bf16.msrb.mxu0 %v1385_v12 }
 0x279   :  { %v1217_v5 = vadd.f32 %v1216_v8, %v1215_v11 }
 0x27a   :  { %v1269_v2 = vsel %vm107_vm1, %v1240_v3, 0.0  ;;  %v1188_v3 = vld [vmem:[%s3136_s7] sm:$0x1]  ;;  %s2178_s7 = smov [#allocation5]  }
 0x27b   :  { %v1027_v7 = vpop.f32.mrf.mxu2  ;;  %v1168_v63 = vpop.f32.mrf.mxu3  ;;  %v1270_v41 = vadd.f32 %v1269_v2, %v1268_v39 }
 0x27c   :  { %v1028_v19 = vadd.f32 %v1027_v7, %v906_v62 }
 0x27e   :  { %v1186_v53 = vadd.f32 %v1168_v63, %v1028_v19 }
 0x280   :  { %v1218_v60 = vsel %vm107_vm1, %v1186_v53, 0.0  ;;  %v1241_v20 = vmul.f32 %v1186_v53, %v1186_v53 }
 0x281   :  { %v1219_v22 = vadd.f32 %v1218_v60, %v1217_v5 }
 0x282   :  { %v1271_v37 = vsel %vm107_vm1, %v1241_v20, 0.0 }
 0x283   :  { %v1220_v34 = vrot.slane %v1219_v22, 4  ;;  %v1272_v25 = vadd.f32 %v1271_v37, %v1270_v41 }
 0x285   :  { %v1221_v26 = vadd.f32 %v1220_v34, %v1219_v22  ;;  %v1273_v44 = vrot.slane %v1272_v25, 4 }
 0x287   :  { %v1222_v21 = vrot.slane %v1221_v26, 2  ;;  %v1274_v9 = vadd.f32 %v1273_v44, %v1272_v25 }
 0x289   :  { %v1223_v27 = vadd.f32 %v1222_v21, %v1221_v26  ;;  %v1275_v31 = vrot.slane %v1274_v9, 2 }
 0x28b   :  { %v1224_v32 = vrot.slane %v1223_v27, 1  ;;  %v1276_v18 = vadd.f32 %v1275_v31, %v1274_v9 }
 0x28d   :  { %v1225_v30 = vadd.f32 %v1224_v32, %v1223_v27  ;;  %v1277_v15 = vrot.slane %v1276_v18, 1 }
 0x28f   :  { %v1278_v38 = vadd.f32 %v1277_v15, %v1276_v18  ;;  %v1279_v43 = vmul.f32 0.0078125, %v1225_v30 }
 0x291   :  { %v1280_v14 = vmul.f32 0.0078125, %v1278_v38  ;;  %v1281_v35 = vmul.f32 %v1279_v43, %v1279_v43 }
 0x293   :  { %v1282_v45 = vsub.f32 %v1280_v14, %v1281_v35 }
 0x295   :  { %v1283_v49 = vadd.f32 1e-05, %v1282_v45 }
 0x297   :  { %2091 = vrsqrt.f32 %v1283_v49  ;;  %vm1290_vm12 = vweird.f32 %v1283_v49 }
 0x29d   :  { %v2092_v10 = vpop.eup %2091 }
 0x29e   :  { %v1285_v50 = vmul.f32 %v2092_v10, %v1283_v49  ;;  %vm1291_vm11 = vweird.f32 %v2092_v10 }
 0x29f   :  { %vm1292_vm13 = vmor %vm1290_vm12, %vm1291_vm11 }
 0x2a0   :  { %v1286_v46 = vmul.f32 %v2092_v10, %v1285_v50 }
 0x2a2   :  { %v1287_v40 = vmul.f32 0.5, %v1286_v46 }
 0x2a4   :  { %v1288_v52 = vsub.f32 1.5, %v1287_v40 }
 0x2a6   :  { %v1289_v56 = vmul.f32 %v2092_v10, %v1288_v52 }
 0x2a8   :  { %v1293_v48 = vsel %vm1292_vm13, %v2092_v10, %v1289_v56 }
 0x2a9   :  { %v1294_v57 = vmul.f32 %v1293_v48, %v1187_v55 }
 0x2ab   :  { %v1295_v59 = vmul.f32 %v1294_v57, %v1279_v43  ;;  %v1298_v61 = vperm.slane %v1294_v57, 0 }
 0x2ad   :  { %v1296_v62 = vsub.f32 %v1188_v3, %v1295_v59  ;;  %v1315_v7 = vmul.f32 %v1298_v61, %v1186_v53  ;;  %v1300_v8 = vmul.f32 %v1298_v61, %v2778_v47  ;;  %v1301_v19 = vmul.f32 %v1298_v61, %v2780_v51 }
 0x2ae   :  { %v1302_v5 = vmul.f32 %v1298_v61, %v2782_v54  ;;  %v1303_v60 = vmul.f32 %v1298_v61, %v2784_v58  ;;  %v1308_v53 = vmul.f32 %v1298_v61, %v2825_v23  ;;  %v1309_v47 = vmul.f32 %v1298_v61, %v2827_v29 }
 0x2af   :  { %v1317_v4 = vperm.slane %v1296_v62, 0  ;;  %v1310_v51 = vmul.f32 %v1298_v61, %v2839_v6  ;;  %v1311_v37 = vmul.f32 %v1298_v61, %v2846_v24  ;;  %v1312_v25 = vmul.f32 %v1298_v61, %v2853_v28 }
 0x2b0   :  { %v1313_v26 = vmul.f32 %v1298_v61, %v2860_v42  ;;  %v1314_v54 = vmul.f32 %v1298_v61, %v2867_v16  ;;  %v1304_v14 = vmul.f32 %v1298_v61, %v2786_v17  ;;  %v1305_v35 = vmul.f32 %v1298_v61, %v2803_v36 }
 0x2b1   :  { %v1319_v63 = vadd.f32 %v1317_v4, %v1300_v8  ;;  %v1320_v0 = vadd.f32 %v1317_v4, %v1301_v19  ;;  %v1321_v20 = vadd.f32 %v1317_v4, %v1302_v5  ;;  %v1322_v41 = vadd.f32 %v1317_v4, %v1303_v60 }
 0x2b2   :  { %v1327_v44 = vadd.f32 %v1317_v4, %v1308_v53  ;;  %v1328_v58 = vadd.f32 %v1317_v4, %v1309_v47  ;;  %v1329_v21 = vadd.f32 %v1317_v4, %v1310_v51  ;;  %v1330_v9 = vadd.f32 %v1317_v4, %v1311_v37 }
 0x2b3   :  { %v1335_v11 = vmax.f32 %v1319_v63, 0.0  ;;  %v1336_v2 = vmax.f32 %v1320_v0, 0.0  ;;  %v1337_v22 = vmax.f32 %v1321_v20, 0.0  ;;  %v1338_v34 = vmax.f32 %v1322_v41, 0.0 }
 0x2b4   :  { %v1331_v27 = vadd.f32 %v1317_v4, %v1312_v25  ;;  %v1332_v31 = vadd.f32 %v1317_v4, %v1313_v26  ;;  %v1333_v23 = vadd.f32 %v1317_v4, %v1314_v54  ;;  %v1334_v32 = vadd.f32 %v1317_v4, %v1315_v7  ;;  %v1741_v7 = vld [vmem:[%s3140_s11] sm:$0xf]  ;;  %s1789_s11 = sshll.u32 %s2178_s7, 4  ;;  %s1790_s11 = int_to_ptr.vmem [resolvable:$true] %s1789_s11 }
 0x2b5   :  { %v1351_v39 = vpack.c.bf16 %v1336_v2, %v1335_v11  ;;  %v1343_v29 = vmax.f32 %v1327_v44, 0.0  ;;  %v1344_v18 = vmax.f32 %v1328_v58, 0.0  ;;  %v1345_v6 = vmax.f32 %v1329_v21, 0.0 }
 0x2b6   :  { %v1346_v30 = vmax.f32 %v1330_v9, 0.0  ;;  %v1347_v24 = vmax.f32 %v1331_v27, 0.0  ;;  %v1348_v15 = vmax.f32 %v1332_v31, 0.0  ;;  %v1349_v38 = vmax.f32 %v1333_v23, 0.0 }
 0x2b7   :  { %1996 = vmatmul.msk.bf16.vlgmr.msrb.gmra.mxu0 %vm107_vm1, %v1351_v39  ;;  %v1350_v28 = vmax.f32 %v1334_v32, 0.0  ;;  %v1355_v43 = vpack.c.bf16 %v1344_v18, %v1343_v29  ;;  %v1352_v1 = vpack.c.bf16 %v1338_v34, %v1337_v22  ;;  %v1323_v45 = vadd.f32 %v1317_v4, %v1304_v14 }
 0x2b8   :  { %v1356_v42 = vpack.c.bf16 %v1346_v30, %v1345_v6  ;;  %v1357_v16 = vpack.c.bf16 %v1348_v15, %v1347_v24  ;;  %v1324_v49 = vadd.f32 %v1317_v4, %v1305_v35  ;;  %v1306_v40 = vmul.f32 %v1298_v61, %v2806_v33 }
 0x2b9   :  { %v1358_v12 = vpack.c.bf16 %v1350_v28, %v1349_v38  ;;  %v1339_v10 = vmax.f32 %v1323_v45, 0.0  ;;  %v1307_v52 = vmul.f32 %v1298_v61, %v2818_v13 }
 0x2ba   :  { %v1340_v50 = vmax.f32 %v1324_v49, 0.0  ;;  %v1325_v55 = vadd.f32 %v1317_v4, %v1306_v40 }
 0x2bb   :  { %v1326_v56 = vadd.f32 %v1317_v4, %v1307_v52  ;;  %v1757_v4 = vsel %vm1755_vm14, %v1741_v7, 0 }
 0x2bc   :  { %v1353_v46 = vpack.c.bf16 %v1340_v50, %v1339_v10  ;;  %v1341_v48 = vmax.f32 %v1325_v55, 0.0  ;;  %1766 = vmatpush.bf16.msrb.mxu1 %v1757_v4 }
 0x2bd   :  { %v1342_v57 = vmax.f32 %v1326_v56, 0.0 }
 0x2bf   :  { %v1354_v3 = vpack.c.bf16 %v1342_v57, %v1341_v48 }
 0x2c7   :  { %1997 = vmatmul.msk.bf16.gmra.mxu0 %vm107_vm1, %v1352_v1 }
 0x2d7   :  { %1998 = vmatmul.msk.bf16.gmra.mxu0 %vm107_vm1, %v1353_v46 }
 0x2e7   :  { %1999 = vmatmul.msk.bf16.gmra.mxu0 %vm107_vm1, %v1354_v3 }
 0x2f7   :  { %2000 = vmatmul.msk.bf16.gmra.mxu0 %vm107_vm1, %v1355_v43 }
 0x307   :  { %2001 = vmatmul.msk.bf16.gmra.mxu0 %vm107_vm1, %v1356_v42 }
 0x317   :  { %2002 = vmatmul.msk.bf16.gmra.mxu0 %vm107_vm1, %v1357_v16 }
 0x327   :  { %2003 = vmatmul.msk.bf16.gmra.mxu0 %vm107_vm1, %v1358_v12 }
 0x334   :  { %v2918_v17 = vpop.f32.mrf.mxu0 }
 0x335   :  { %v1475_v39 = vmul.f32 %v2918_v17, %v2918_v17  ;;  %v1438_v20 = vsel %vm677_vm9, %v2918_v17, 0.0 }
 0x337   :  { %v1491_v51 = vsel %vm677_vm9, %v1475_v39, 0.0 }
 0x33c   :  { %v2920_v36 = vpop.f32.mrf.mxu0 }
 0x33d   :  { %v1476_v2 = vmul.f32 %v2920_v36, %v2920_v36  ;;  %v1439_v5 = vsel %vm677_vm9, %v2920_v36, 0.0 }
 0x33e   :  { %v1440_v47 = vadd.f32 %v1439_v5, %v1438_v20 }
 0x33f   :  { %v1492_v41 = vsel %vm677_vm9, %v1476_v2, 0.0 }
 0x340   :  { %v1493_v26 = vadd.f32 %v1492_v41, %v1491_v51 }
 0x344   :  { %v2922_v33 = vpop.f32.mrf.mxu0 }
 0x345   :  { %v1477_v60 = vmul.f32 %v2922_v33, %v2922_v33  ;;  %v1441_v22 = vsel %vm677_vm9, %v2922_v33, 0.0 }
 0x346   :  { %v1442_v54 = vadd.f32 %v1441_v22, %v1440_v47 }
 0x347   :  { %v1494_v37 = vsel %vm677_vm9, %v1477_v60, 0.0 }
 0x348   :  { %v1495_v27 = vadd.f32 %v1494_v37, %v1493_v26 }
 0x34c   :  { %v2924_v13 = vpop.f32.mrf.mxu0 }
 0x34d   :  { %v1478_v53 = vmul.f32 %v2924_v13, %v2924_v13  ;;  %v1443_v34 = vsel %vm677_vm9, %v2924_v13, 0.0 }
 0x34e   :  { %v1444_v31 = vadd.f32 %v1443_v34, %v1442_v54 }
 0x34f   :  { %v1496_v58 = vsel %vm677_vm9, %v1478_v53, 0.0 }
 0x350   :  { %v1497_v18 = vadd.f32 %v1496_v58, %v1495_v27 }
 0x354   :  { %v2926_v59 = vpop.f32.mrf.mxu0 }
 0x355   :  { %v1479_v25 = vmul.f32 %v2926_v59, %v2926_v59  ;;  %v1445_v21 = vsel %vm677_vm9, %v2926_v59, 0.0 }
 0x356   :  { %v1446_v6 = vadd.f32 %v1445_v21, %v1444_v31 }
 0x357   :  { %v1498_v23 = vsel %vm677_vm9, %v1479_v25, 0.0 }
 0x358   :  { %v1499_v38 = vadd.f32 %v1498_v23, %v1497_v18 }
 0x35c   :  { %v2928_v61 = vpop.f32.mrf.mxu0 }
 0x35d   :  { %v1480_v9 = vmul.f32 %v2928_v61, %v2928_v61  ;;  %v1447_v32 = vsel %vm677_vm9, %v2928_v61, 0.0 }
 0x35e   :  { %v1448_v28 = vadd.f32 %v1447_v32, %v1446_v6 }
 0x35f   :  { %v1500_v30 = vsel %vm677_vm9, %v1480_v9, 0.0 }
 0x360   :  { %v1501_v16 = vadd.f32 %v1500_v30, %v1499_v38 }
 0x364   :  { %v2930_v62 = vpop.f32.mrf.mxu0 }
 0x365   :  { %v1481_v29 = vmul.f32 %v2930_v62, %v2930_v62  ;;  %v1449_v24 = vsel %vm677_vm9, %v2930_v62, 0.0 }
 0x366   :  { %v1450_v12 = vadd.f32 %v1449_v24, %v1448_v28 }
 0x367   :  { %v1502_v43 = vsel %vm677_vm9, %v1481_v29, 0.0 }
 0x368   :  { %v1503_v10 = vadd.f32 %v1502_v43, %v1501_v16 }
 0x36c   :  { %v2935_v8 = vpop.f32.mrf.mxu0 }
 0x36d   :  { %v1482_v15 = vmul.f32 %v2935_v8, %v2935_v8  ;;  %v1451_v42 = vsel %vm677_vm9, %v2935_v8, 0.0 }
 0x36e   :  { %v1452_v50 = vadd.f32 %v1451_v42, %v1450_v12 }
 0x36f   :  { %v1504_v35 = vsel %vm677_vm9, %v1482_v15, 0.0 }
 0x370   :  { %v1505_v55 = vadd.f32 %v1504_v35, %v1503_v10 }
 0x374   :  { %v2937_v19 = vpop.f32.mrf.mxu0 }
 0x375   :  { %v1483_v1 = vmul.f32 %v2937_v19, %v2937_v19  ;;  %v1453_v45 = vsel %vm677_vm9, %v2937_v19, 0.0 }
 0x376   :  { %v1454_v56 = vadd.f32 %v1453_v45, %v1452_v50 }
 0x377   :  { %v1506_v46 = vsel %vm677_vm9, %v1483_v1, 0.0 }
 0x378   :  { %v1507_v7 = vadd.f32 %v1506_v46, %v1505_v55 }
 0x37c   :  { %v2939_v63 = vpop.f32.mrf.mxu0 }
 0x37d   :  { %v1484_v49 = vmul.f32 %v2939_v63, %v2939_v63  ;;  %v1455_v40 = vsel %vm677_vm9, %v2939_v63, 0.0 }
 0x37e   :  { %v1456_v4 = vadd.f32 %v1455_v40, %v1454_v56 }
 0x37f   :  { %v1508_v48 = vsel %vm677_vm9, %v1484_v49, 0.0 }
 0x380   :  { %v1509_v60 = vadd.f32 %v1508_v48, %v1507_v7 }
 0x384   :  { %v2941_v0 = vpop.f32.mrf.mxu0 }
 0x385   :  { %v1485_v52 = vmul.f32 %v2941_v0, %v2941_v0  ;;  %v1457_v57 = vsel %vm677_vm9, %v2941_v0, 0.0 }
 0x386   :  { %v1458_v20 = vadd.f32 %v1457_v57, %v1456_v4 }
 0x387   :  { %v1510_v2 = vsel %vm677_vm9, %v1485_v52, 0.0 }
 0x388   :  { %v1511_v51 = vadd.f32 %v1510_v2, %v1509_v60 }
 0x38c   :  { %v2943_v11 = vpop.f32.mrf.mxu0 }
 0x38d   :  { %v1486_v3 = vmul.f32 %v2943_v11, %v2943_v11  ;;  %v1459_v39 = vsel %vm677_vm9, %v2943_v11, 0.0 }
 0x38e   :  { %v1460_v37 = vadd.f32 %v1459_v39, %v1458_v20 }
 0x38f   :  { %v1512_v22 = vsel %vm677_vm9, %v1486_v3, 0.0 }
 0x390   :  { %v1513_v54 = vadd.f32 %v1512_v22, %v1511_v51 }
 0x394   :  { %v2966_v44 = vpop.f32.mrf.mxu0 }
 0x395   :  { %v1487_v5 = vmul.f32 %v2966_v44, %v2966_v44  ;;  %v1461_v53 = vsel %vm677_vm9, %v2966_v44, 0.0 }
 0x396   :  { %v1462_v58 = vadd.f32 %v1461_v53, %v1460_v37  ;;  %v1437_v53 = vld [vmem:[%s3139_s10] sm:$0x1] }
 0x397   :  { %v1514_v34 = vsel %vm677_vm9, %v1487_v5, 0.0  ;;  %v1436_v5 = vld [vmem:[%s3138_s9] sm:$0x1]  ;;  %s2177_s9 = smov [#allocation3]  }
 0x398   :  { %v1515_v27 = vadd.f32 %v1514_v34, %v1513_v54  ;;  %s1778_s10 = sshll.u32 %s2177_s9, 4  ;;  %s2179_s9 = smov [#allocation7]   ;;  %s1779_s10 = int_to_ptr.vmem [resolvable:$true] %s1778_s10 }
 0x39c   :  { %v2988_v14 = vpop.f32.mrf.mxu0 }
 0x39d   :  { %v1488_v47 = vmul.f32 %v2988_v14, %v2988_v14  ;;  %v1463_v25 = vsel %vm677_vm9, %v2988_v14, 0.0 }
 0x39e   :  { %v1464_v31 = vadd.f32 %v1463_v25, %v1462_v58 }
 0x39f   :  { %v1516_v21 = vsel %vm677_vm9, %v1488_v47, 0.0 }
 0x3a0   :  { %v1517_v32 = vadd.f32 %v1516_v21, %v1515_v27 }
 0x3a4   :  { %v3010_v41 = vpop.f32.mrf.mxu0 }
 0x3a5   :  { %v1489_v26 = vmul.f32 %v3010_v41, %v3010_v41  ;;  %v1465_v9 = vsel %vm677_vm9, %v3010_v41, 0.0 }
 0x3a6   :  { %v1466_v29 = vadd.f32 %v1465_v9, %v1464_v31 }
 0x3a7   :  { %v1518_v23 = vsel %vm677_vm9, %v1489_v26, 0.0 }
 0x3a8   :  { %v1519_v24 = vadd.f32 %v1518_v23, %v1517_v32 }
 0x3ac   :  { %v1433_v18 = vpop.f32.mrf.mxu0 }
 0x3ad   :  { %v1467_v6 = vsel %vm677_vm9, %v1433_v18, 0.0  ;;  %v1490_v30 = vmul.f32 %v1433_v18, %v1433_v18 }
 0x3ae   :  { %v1468_v15 = vadd.f32 %v1467_v6, %v1466_v29 }
 0x3af   :  { %v1520_v38 = vsel %vm677_vm9, %v1490_v30, 0.0 }
 0x3b0   :  { %v1469_v28 = vrot.slane %v1468_v15, 4  ;;  %v1521_v43 = vadd.f32 %v1520_v38, %v1519_v24 }
 0x3b2   :  { %v1470_v42 = vadd.f32 %v1469_v28, %v1468_v15  ;;  %v1522_v1 = vrot.slane %v1521_v43, 4 }
 0x3b4   :  { %v1471_v16 = vrot.slane %v1470_v42, 2  ;;  %v1523_v12 = vadd.f32 %v1522_v1, %v1521_v43 }
 0x3b6   :  { %v1472_v35 = vadd.f32 %v1471_v16, %v1470_v42  ;;  %v1524_v45 = vrot.slane %v1523_v12, 2 }
 0x3b8   :  { %v1473_v49 = vrot.slane %v1472_v35, 1  ;;  %v1525_v10 = vadd.f32 %v1524_v45, %v1523_v12 }
 0x3ba   :  { %v1474_v50 = vadd.f32 %v1473_v49, %v1472_v35  ;;  %v1526_v46 = vrot.slane %v1525_v10, 1 }
 0x3bc   :  { %v1527_v40 = vadd.f32 %v1526_v46, %v1525_v10  ;;  %v1528_v52 = vmul.f32 0.0078125, %v1474_v50 }
 0x3be   :  { %v1529_v55 = vmul.f32 0.0078125, %v1527_v40  ;;  %v1530_v56 = vmul.f32 %v1528_v52, %v1528_v52 }
 0x3c0   :  { %v1531_v48 = vsub.f32 %v1529_v55, %v1530_v56 }
 0x3c2   :  { %v1532_v57 = vadd.f32 1e-05, %v1531_v48 }
 0x3c4   :  { %2093 = vrsqrt.f32 %v1532_v57  ;;  %vm1539_vm0 = vweird.f32 %v1532_v57 }
 0x3ca   :  { %v2094_v3 = vpop.eup %2093 }
 0x3cb   :  { %v1534_v7 = vmul.f32 %v2094_v3, %v1532_v57  ;;  %vm1540_vm15 = vweird.f32 %v2094_v3 }
 0x3cc   :  { %vm1541_vm1 = vmor %vm1539_vm0, %vm1540_vm15 }
 0x3cd   :  { %v1535_v4 = vmul.f32 %v2094_v3, %v1534_v7 }
 0x3cf   :  { %v1536_v2 = vmul.f32 0.5, %v1535_v4 }
 0x3d1   :  { %v1537_v39 = vsub.f32 1.5, %v1536_v2 }
 0x3d3   :  { %v1538_v60 = vmul.f32 %v2094_v3, %v1537_v39 }
 0x3d5   :  { %v1542_v20 = vsel %vm1541_vm1, %v2094_v3, %v1538_v60 }
 0x3d6   :  { %v1543_v22 = vmul.f32 %v1542_v20, %v1436_v5 }
 0x3d8   :  { %v1544_v47 = vmul.f32 %v1543_v22, %v1528_v52  ;;  %v1547_v51 = vperm.slane %v1543_v22, 0 }
 0x3da   :  { %v1545_v37 = vsub.f32 %v1437_v53, %v1544_v47  ;;  %v1557_v34 = vmul.f32 %v1547_v51, %v2937_v19  ;;  %v1558_v25 = vmul.f32 %v1547_v51, %v2939_v63  ;;  %v1559_v26 = vmul.f32 %v1547_v51, %v2941_v0 }
 0x3db   :  { %v1560_v54 = vmul.f32 %v1547_v51, %v2943_v11  ;;  %v1561_v21 = vmul.f32 %v1547_v51, %v2966_v44  ;;  %v1562_v32 = vmul.f32 %v1547_v51, %v2988_v14  ;;  %v1563_v29 = vmul.f32 %v1547_v51, %v3010_v41 }
 0x3dc   :  { %v1566_v58 = vperm.slane %v1545_v37, 0  ;;  %v1564_v63 = vmul.f32 %v1547_v51, %v1433_v18  ;;  %v1549_v0 = vmul.f32 %v1547_v51, %v2918_v17  ;;  %v1550_v11 = vmul.f32 %v1547_v51, %v2920_v36 }
 0x3dd   :  { %v1551_v15 = vmul.f32 %v1547_v51, %v2922_v33  ;;  %v1552_v41 = vmul.f32 %v1547_v51, %v2924_v13  ;;  %v1553_v42 = vmul.f32 %v1547_v51, %v2926_v59  ;;  %v1554_v1 = vmul.f32 %v1547_v51, %v2928_v61 }
 0x3de   :  { %v1576_v9 = vadd.f32 %v1566_v58, %v1557_v34  ;;  %v1577_v27 = vadd.f32 %v1566_v58, %v1558_v25  ;;  %v1578_v31 = vadd.f32 %v1566_v58, %v1559_v26  ;;  %v1579_v23 = vadd.f32 %v1566_v58, %v1560_v54 }
 0x3df   :  { %v1580_v6 = vadd.f32 %v1566_v58, %v1561_v21  ;;  %v1581_v44 = vadd.f32 %v1566_v58, %v1562_v32  ;;  %v1582_v18 = vadd.f32 %v1566_v58, %v1563_v29  ;;  %v1568_v36 = vadd.f32 %v1566_v58, %v1549_v0 }
 0x3e0   :  { %v1592_v30 = vmax.f32 %v1576_v9, 0.0  ;;  %v1593_v19 = vmax.f32 %v1577_v27, 0.0  ;;  %v1594_v24 = vmax.f32 %v1578_v31, 0.0  ;;  %v1595_v38 = vmax.f32 %v1579_v23, 0.0 }
 0x3e1   :  { %v1596_v16 = vmax.f32 %v1580_v6, 0.0  ;;  %v1569_v33 = vadd.f32 %v1566_v58, %v1550_v11  ;;  %v1570_v35 = vadd.f32 %v1566_v58, %v1551_v15  ;;  %v1571_v45 = vadd.f32 %v1566_v58, %v1552_v41 }
 0x3e2   :  { %v1621_v28 = vsel %vm677_vm9, %v1592_v30, 0.0  ;;  %v1622_v43 = vsel %vm677_vm9, %v1593_v19, 0.0  ;;  %v1624_v17 = vsel %vm677_vm9, %v1594_v24, 0.0  ;;  %v1583_v49 = vadd.f32 %v1566_v58, %v1564_v63 }
 0x3e3   :  { %v1623_v14 = vadd.f32 %v1622_v43, %v1621_v28  ;;  %v1597_v10 = vmax.f32 %v1581_v44, 0.0  ;;  %v1626_v50 = vsel %vm677_vm9, %v1595_v38, 0.0  ;;  %v1572_v46 = vadd.f32 %v1566_v58, %v1553_v42 }
 0x3e4   :  { %v1584_v13 = vmax.f32 %v1568_v36, 0.0  ;;  %v1585_v52 = vmax.f32 %v1569_v33, 0.0  ;;  %v1586_v59 = vmax.f32 %v1570_v35, 0.0  ;;  %v1598_v55 = vmax.f32 %v1582_v18, 0.0 }
 0x3e5   :  { %v1625_v12 = vadd.f32 %v1624_v17, %v1623_v14  ;;  %v1628_v61 = vsel %vm677_vm9, %v1596_v16, 0.0  ;;  %v1555_v56 = vmul.f32 %v1547_v51, %v2930_v62  ;;  %v1573_v48 = vadd.f32 %v1566_v58, %v1554_v1 }
 0x3e6   :  { %v1587_v3 = vmax.f32 %v1571_v45, 0.0  ;;  %v1600_v7 = vsel %vm677_vm9, %v1584_v13, 0.0  ;;  %v1601_v4 = vsel %vm677_vm9, %v1585_v52, 0.0  ;;  %v1599_v2 = vmax.f32 %v1583_v49, 0.0 }
 0x3e7   :  { %v1627_v40 = vadd.f32 %v1626_v50, %v1625_v12  ;;  %v1630_v39 = vsel %vm677_vm9, %v1597_v10, 0.0  ;;  %v1556_v5 = vmul.f32 %v1547_v51, %v2935_v8  ;;  %v1602_v60 = vadd.f32 %v1601_v4, %v1600_v7  ;;  %v2076_v7 = vld [vmem:[%s3130_s1 + $0x28] sm:$0xff]  }
 0x3e8   :  { %v1574_v22 = vadd.f32 %v1566_v58, %v1555_v56  ;;  %v1588_v53 = vmax.f32 %v1572_v46, 0.0  ;;  %v1603_v47 = vsel %vm677_vm9, %v1586_v59, 0.0  ;;  %v1632_v62 = vsel %vm677_vm9, %v1598_v55, 0.0  ;;  %v2041_v59 = vld [vmem:[%s3130_s1] sm:$0xff]   ;;  %v2072_v55 = vld [vmem:[%s3130_s1 + $0x8] sm:$0xff]  }
 0x3e9   :  { %v1629_v57 = vadd.f32 %v1628_v61, %v1627_v40  ;;  %v1575_v37 = vadd.f32 %v1566_v58, %v1556_v5  ;;  %v1604_v34 = vadd.f32 %v1603_v47, %v1602_v60  ;;  %v1589_v26 = vmax.f32 %v1573_v48, 0.0  ;;  %v2077_v60 = vld [vmem:[%s3130_s1 + $0x30] sm:$0xff]  }
 0x3ea   :  { %v1605_v54 = vsel %vm677_vm9, %v1587_v3, 0.0  ;;  %v2176_v21 = vmov 64.0   ;;  %v1634_v9 = vsel %vm677_vm9, %v1599_v2, 0.0  ;;  %v1590_v51 = vmax.f32 %v1574_v22, 0.0  ;;  %v2075_v3 = vld [vmem:[%s3130_s1 + $0x20] sm:$0xff]  }
 0x3eb   :  { %v1631_v20 = vadd.f32 %v1630_v39, %v1629_v57  ;;  %2095 = vrcp.f32 %v2176_v21  ;;  %v1606_v27 = vadd.f32 %v1605_v54, %v1604_v34  ;;  %v1607_v31 = vsel %vm677_vm9, %v1588_v53, 0.0  ;;  %v2073_v57 = vld [vmem:[%s3130_s1 + $0x10] sm:$0xff]   ;;  %v2074_v34 = vld [vmem:[%s3130_s1 + $0x18] sm:$0xff]  }
 0x3ec   :  { %v1591_v29 = vmax.f32 %v1575_v37, 0.0  ;;  %v1609_v6 = vsel %vm677_vm9, %v1589_v26, 0.0  ;;  %v1611_v24 = vsel %vm677_vm9, %v1590_v51, 0.0  ;;  %v2042_v61 = vunpack.c.l.bf16 %v2041_v59 }
 0x3ed   :  { %v1633_v25 = vadd.f32 %v1632_v62, %v1631_v20  ;;  %v1608_v23 = vadd.f32 %v1607_v31, %v1606_v27  ;;  %v2043_v56 = vunpack.c.h.bf16 %v2041_v59  ;;  %v2046_v48 = vunpack.c.l.bf16 %v2072_v55 }
 0x3ee   :  { %v1613_v15 = vsel %vm677_vm9, %v1591_v29, 0.0  ;;  %v2047_v4 = vunpack.c.h.bf16 %v2072_v55  ;;  %v2058_v2 = vunpack.c.l.bf16 %v2075_v3  ;;  %v2059_v39 = vunpack.c.h.bf16 %v2075_v3 }
 0x3ef   :  { %v1635_v8 = vadd.f32 %v1634_v9, %v1633_v25  ;;  %v1610_v58 = vadd.f32 %v1609_v6, %v1608_v23  ;;  %v2062_v5 = vunpack.c.l.bf16 %v2076_v7  ;;  %v2050_v20 = vunpack.c.l.bf16 %v2073_v57 }
 0x3f0   :  { %v2063_v22 = vunpack.c.h.bf16 %v2076_v7  ;;  %v1683_v53 = vsel %vm677_vm9, %v2042_v61, 0.0  ;;  %v1684_v47 = vsel %vm677_vm9, %v2043_v56, 0.0  ;;  %v1686_v62 = vsel %vm677_vm9, %v2046_v48, 0.0 }
 0x3f1   :  { %v1636_v32 = vrot.slane %v1635_v8, 4  ;;  %v2096_v30 = vpop.eup %2095  ;;  %v1612_v63 = vadd.f32 %v1611_v24, %v1610_v58  ;;  %v2051_v37 = vunpack.c.h.bf16 %v2073_v57  ;;  %v2066_v25 = vunpack.c.l.bf16 %v2077_v60 }
 0x3f2   :  { %v1643_v0 = vmul.f32 64.0, %v2096_v30  ;;  %vm1647_vm2 = vweird.f32 %v2096_v30  ;;  %v1685_v26 = vadd.f32 %v1684_v47, %v1683_v53  ;;  %v1688_v54 = vsel %vm677_vm9, %v2047_v4, 0.0 }
 0x3f3   :  { %v1637_v19 = vadd.f32 %v1636_v32, %v1635_v8  ;;  %v1614_v44 = vadd.f32 %v1613_v15, %v1612_v63  ;;  %v1704_v21 = vsel %vm677_vm9, %v2058_v2, 0.0  ;;  %v1705_v9 = vsel %vm677_vm9, %v2059_v39, 0.0  ;;  %v2078_v8 = vld [vmem:[%s3130_s1 + $0x38] sm:$0xff]  }
 0x3f4   :  { %v1644_v38 = vsub.f32 1.0, %v1643_v0  ;;  %v1707_v27 = vsel %vm677_vm9, %v2062_v5, 0.0  ;;  %v1687_v51 = vadd.f32 %v1686_v62, %v1685_v26  ;;  %v1706_v31 = vadd.f32 %v1705_v9, %v1704_v21 }
 0x3f5   :  { %v1638_v11 = vrot.slane %v1637_v19, 2  ;;  %v1615_v43 = vrot.slane %v1614_v44, 4  ;;  %v2054_v23 = vunpack.c.l.bf16 %v2074_v34  ;;  %v2067_v32 = vunpack.c.h.bf16 %v2077_v60 }
 0x3f6   :  { %v1645_v14 = vmul.f32 %v2096_v30, %v1644_v38  ;;  %v1690_v29 = vsel %vm677_vm9, %v2050_v20, 0.0  ;;  %v1709_v6 = vsel %vm677_vm9, %v2063_v22, 0.0  ;;  %v1689_v58 = vadd.f32 %v1688_v54, %v1687_v51 }
 0x3f7   :  { %v1639_v28 = vadd.f32 %v1638_v11, %v1637_v19  ;;  %v1616_v42 = vadd.f32 %v1615_v43, %v1614_v44  ;;  %v2055_v19 = vunpack.c.h.bf16 %v2074_v34  ;;  %v2070_v24 = vunpack.c.l.bf16 %v2078_v8 }
 0x3f8   :  { %v1646_v1 = vadd.f32 %v2096_v30, %v1645_v14  ;;  %v1692_v63 = vsel %vm677_vm9, %v2051_v37, 0.0  ;;  %v1711_v0 = vsel %vm677_vm9, %v2066_v25, 0.0  ;;  %v1691_v11 = vadd.f32 %v1690_v29, %v1689_v58 }
 0x3f9   :  { %v1640_v41 = vrot.slane %v1639_v28, 1  ;;  %v1617_v16 = vrot.slane %v1616_v42, 2  ;;  %v2071_v44 = vunpack.c.h.bf16 %v2078_v8  ;;  %v1694_v38 = vsel %vm677_vm9, %v2054_v23, 0.0 }
 0x3fa   :  { %v3065_v17 = vsel %vm1647_vm2, %v2096_v30, %v1646_v1  ;;  %v1708_v30 = vadd.f32 %v1707_v27, %v1706_v31  ;;  %v1693_v43 = vadd.f32 %v1692_v63, %v1691_v11 }
 0x3fb   :  { %v1641_v18 = vadd.f32 %v1640_v41, %v1639_v28  ;;  %v1618_v36 = vadd.f32 %v1617_v16, %v1616_v42  ;;  %v1713_v28 = vsel %vm677_vm9, %v2067_v32, 0.0  ;;  %v1696_v41 = vsel %vm677_vm9, %v2055_v19, 0.0 }
 0x3fc   :  { %v1710_v15 = vadd.f32 %v1709_v6, %v1708_v30  ;;  %v1715_v42 = vsel %vm677_vm9, %v2070_v24, 0.0  ;;  %v1695_v1 = vadd.f32 %v1694_v38, %v1693_v43  ;;  %v1717_v16 = vsel %vm677_vm9, %v2071_v44, 0.0 }
 0x3fd   :  { %v1650_v12 = vmul.f32 %v3065_v17, %v1641_v18  ;;  %v1619_v33 = vrot.slane %v1618_v36, 1 }
 0x3fe   :  { %v1712_v14 = vadd.f32 %v1711_v0, %v1710_v15 }
 0x3ff   :  { %v1620_v35 = vadd.f32 %v1619_v33, %v1618_v36  ;;  %v1740_v45 = vpack.c.bf16 %v1650_v12, %v1650_v12  ;;  %v1697_v36 = vadd.f32 %v1696_v41, %v1695_v1 }
 0x400   :  { %v1714_v18 = vadd.f32 %v1713_v28, %v1712_v14 }
 0x401   :  { %v1649_v49 = vmul.f32 %v3065_v17, %v1620_v35  ;;  %v1749_v50 = vunpack.c.l.b16 %v1740_v45  ;;  %v1698_v33 = vrot.slane %v1697_v36, 4 }
 0x403   :  { %v1739_v10 = vpack.c.bf16 %v1649_v49, %v1649_v49  ;;  %v1730_v52 = vsel %vm1729_vm3, %v1650_v12, %v1649_v49  ;;  %v1716_v12 = vadd.f32 %v1715_v42, %v1714_v18  ;;  %v1699_v45 = vadd.f32 %v1698_v33, %v1697_v36 }
 0x404   :  { %1733 = vst.msk [vmem:[#allocation3] sm:$0x3] %vm1732_vm4, %v1730_v52 }
 0x405   :  { %v1748_v46 = vunpack.c.l.b16 %v1739_v10  ;;  %1783 = dma.vmem_to_hbm [thread:$0]  %s1779_s10, 32, %s1781_s25, [#allocation4]   ;;  %v1718_v35 = vadd.f32 %v1717_v16, %v1716_v12  ;;  %v1700_v10 = vrot.slane %v1699_v45, 2 }
 0x407   :  { %v1750_v40 = vsel %vm1729_vm3, %v1749_v50, %v1748_v46  ;;  %v1719_v49 = vrot.slane %v1718_v35, 4  ;;  %v2088_v46 = vld [vmem:[%s3141_s12] ss:$0 sm:$0xff]  ;;  %s1800_s12 = sshll.u32 %s2179_s9, 4  ;;  %s1801_s12 = int_to_ptr.vmem [resolvable:$true] %s1800_s12 }
 0x408   :  { %v1751_v13 = vpack.c.b16 %v1750_v40, %v1750_v40  ;;  %v1701_v40 = vadd.f32 %v1700_v10, %v1699_v45 }
 0x409   :  { %v1720_v50 = vadd.f32 %v1719_v49, %v1718_v35 }
 0x40a   :  { %2004 = vmatmul.msk.bf16.vlgmr.msrb.gmra.mxu1 %vm677_vm9, %v1751_v13  ;;  %v1702_v52 = vrot.slane %v1701_v40, 1 }
 0x40b   :  { %v1721_v13 = vrot.slane %v1720_v50, 2 }
 0x40c   :  { %v1703_v56 = vadd.f32 %v1702_v52, %v1701_v40 }
 0x40d   :  { %v1722_v59 = vadd.f32 %v1721_v13, %v1720_v50 }
 0x40e   :  { %v1725_v3 = vmul.f32 %v1703_v56, %v3065_v17 }
 0x40f   :  { %v1723_v48 = vrot.slane %v1722_v59, 1 }
 0x411   :  { %v1724_v57 = vadd.f32 %v1723_v48, %v1722_v59 }
 0x413   :  { %v1726_v7 = vmul.f32 %v1724_v57, %v3065_v17 }
 0x415   :  { %v1736_v4 = vsel %vm1729_vm3, %v1726_v7, %v1725_v3 }
 0x416   :  { %1738 = vst.msk [vmem:[#allocation5] sm:$0x3] %vm1732_vm4, %v1736_v4 }
 0x417   :  { %1794 = dma.vmem_to_hbm [thread:$0]  %s1790_s11, 32, %s1792_s4, [#allocation6]  }
 0x487   :  { %v1768_v55 = vpop.f32.mrf.mxu1 }
 0x488   :  { %v1769_v61 = vadd.f32 %v2088_v46, %v1768_v55 }
 0x48a   :  { %1772 = vst [vmem:[#allocation7] sm:$0x3] %v1769_v61 }
 0x48b   :  { %1805 = dma.vmem_to_hbm [thread:$0]  %s1801_s12, 32, %s1803_s24, [#allocation6]  }
 0x48f   :  { %v1770_v2 = vpop.f32.mrf.mxu1 }
 0x490   :  { %2169 = dma.done.wait [#allocation4], 32  }
 0x491   :  { %2170 = vsyncadd [#allocation4], 4294967264 }
 0x492   :  { %2171 = dma.done.wait [#allocation6], 64  }
 0x493   :  { %2172 = vsyncadd [#allocation6], 4294967232 }
 0x494   :  { %1818 = vsyncpa [#allocation4], 1 }
 0x495   :  { %1819 = vsyncpa [#allocation6], 1 }

</bundles_post_ra>
